<compile_context>
chip_gen: v6e
topology: v6e:2x2x1
jax: 0.10.0
libtpu: 0.0.40
codegen_flags: <defaults>
</compile_context>

<pallas_src>
from functools import partial

import jax
import jax.numpy as jnp
from jax.experimental import pallas as pl
from jax.experimental.pallas import tpu as pltpu


def _cross_win_attn_kernel(q_ref, k_ref, v_ref, skip_ref,
                           ln_g_ref, ln_b_ref, w_qkv_ref, b_qkv_ref,
                           w_p_ref, b_p_ref, o_ref,
                           *, heads, dim_head, n_views, win, Lt, Nq, Nk, D):
    """One grid step = (one batch element) x (Lt windows)."""
    hd = heads * dim_head

    def layernorm(x_ref, rows, idx):
        # Load bf16 slab, merge leading dims (layout no-op), LN stats in f32.
        x = x_ref[0].reshape(rows, D).astype(jnp.float32)
        mu = jnp.mean(x, axis=-1, keepdims=True)
        var = jnp.mean(jnp.square(x - mu), axis=-1, keepdims=True)
        xn = (x - mu) * jax.lax.rsqrt(var + 1e-5)
        return (xn * ln_g_ref[idx] + ln_b_ref[idx]).astype(jnp.bfloat16)

    qn = layernorm(q_ref, Lt * Nq, 0)
    kn = layernorm(k_ref, Lt * Nk, 1)
    vn = layernorm(v_ref, Lt * Nk, 2)

    def project(xn, idx):
        # Packed over heads: one (rows, D) @ (D, heads*dh) MXU pass.
        y = jnp.dot(xn, w_qkv_ref[idx],
                    preferred_element_type=jnp.float32) + b_qkv_ref[idx]
        return y.astype(jnp.bfloat16)

    q_all = project(qn, 0)                 # (Lt*Nq, hd); softmax scale folded in
    k_all = project(kn, 1)                 # (Lt*Nk, hd)
    v_all = project(vn, 2)                 # (Lt*Nk, hd)

    # Per-head attention: static lane slices of the packed activations are
    # cheap; the attention itself is inherently per-head.
    # TODO(synk): at large head counts switch to an (l, h)-batched einsum to
    # cut MXU passes further (kept as a small unrolled loop here).
    head_outs = []
    for h in range(heads):
        lo, hi = h * dim_head, (h + 1) * dim_head
        q3 = q_all[:, lo:hi].reshape(Lt, Nq, dim_head)
        k3 = k_all[:, lo:hi].reshape(Lt, Nk, dim_head)
        v3 = v_all[:, lo:hi].reshape(Lt, Nk, dim_head)
        s = jnp.einsum('lqd,lkd->lqk', q3, k3,
                       preferred_element_type=jnp.float32)        # (Lt, Nq, Nk)
        s = s - jnp.max(s, axis=-1, keepdims=True)
        e = jnp.exp(s)
        att = e * pl.reciprocal(jnp.sum(e, axis=-1, keepdims=True), approx=True)
        head_outs.append(
            jnp.einsum('lqk,lkd->lqd', att.astype(jnp.bfloat16), v3,
                       preferred_element_type=jnp.float32))       # (Lt, Nq, dh)
    a = head_outs[0] if heads == 1 else jnp.concatenate(head_outs, axis=-1)

    # Sum over camera views (1/n_views is folded into w_p), then a single
    # packed output projection, residual add and slab store.
    a = jnp.sum(a.reshape(Lt, n_views, win, hd), axis=1)          # (Lt, win, hd)
    a = a.reshape(Lt * win, hd).astype(jnp.bfloat16)
    z = jnp.dot(a, w_p_ref[...], preferred_element_type=jnp.float32) + b_p_ref[...]
    o_ref[0] = z + skip_ref[0]


def _choose_window_tile(L, win, per_window_bytes, budget_bytes=6 << 20):
    """Largest window tile that fits the VMEM budget, keeps (Lt*win) % 8 == 0
    (or covers the full extent) and, when possible, leaves >= 2 steps along the
    window axis for DMA/compute pipelining."""
    cands = [lt for lt in range(1, L + 1)
             if L % lt == 0 and ((lt * win) % 8 == 0 or lt == L)]
    fitting = [lt for lt in cands if lt * per_window_bytes <= budget_bytes]
    if not fitting:
        return min(cands)
    pipelined = [lt for lt in fitting if L // lt >= 2]
    return max(pipelined) if pipelined else max(fitting)


@partial(jax.jit, static_argnames=("heads", "dim_head"))
def cross_win_attention(q, k, v, params, *, heads, dim_head, skip=None):
    """Mirrors CrossWinAttention.forward.

    q: (b, n, X, Y, W1, W2, d);  k, v: (b, n, x, y, w1, w2, d);  X*Y == x*y.
    skip: optional (b, X, Y, W1, W2, d).  Returns (b, X, Y, W1, W2, d) f32.
    """
    b, n, X, Y, W1, W2, D = q.shape
    _, _, xh, yw, w1, w2, _ = k.shape
    assert k.shape == v.shape
    assert X * Y == xh * yw
    L = X * Y
    win = W1 * W2
    Nq = n * W1 * W2
    Nk = n * w1 * w2
    hd = heads * dim_head
    scale = dim_head ** (-0.5)

    def to_slab(t, hh, ww, wh, wwid):
        # b n h w wh ww d -> b (h w) (n wh ww) d, bf16 cast fused with the
        # transpose so the materialized copy is half size.
        # TODO(synk): expressing this re-layout purely via BlockSpec index_map
        # on the original 7-D array would remove the copy entirely, at the
        # cost of one-window-per-grid-step granularity.
        t = jnp.transpose(t, (0, 2, 3, 1, 4, 5, 6))
        return t.reshape(b, hh * ww, n * wh * wwid, D).astype(jnp.bfloat16)

    q_r = to_slab(q, X, Y, W1, W2)            # (b, L, Nq, D) bf16
    k_r = to_slab(k, xh, yw, w1, w2)          # (b, L, Nk, D) bf16
    v_r = to_slab(v, xh, yw, w1, w2)

    if skip is None:
        skip_r = jnp.zeros((b, L * win, D), jnp.float32)
    else:
        skip_r = skip.reshape(b, L * win, D).astype(jnp.float32)

    # Fold the softmax scale into the q projection and 1/n_views into the
    # output projection; MXU weights in bf16, biases / LN params stay f32.
    w_qkv = params["w_qkv"].astype(jnp.float32).at[0].multiply(scale).astype(jnp.bfloat16)
    b_qkv = params["b_qkv"].astype(jnp.float32).at[0].multiply(scale)
    w_p = (params["w_p"].astype(jnp.float32) * (1.0 / n)).astype(jnp.bfloat16)
    b_p = params["b_p"].astype(jnp.float32)
    ln_g = params["ln_g"].astype(jnp.float32)
    ln_b = params["ln_b"].astype(jnp.float32)

    per_window = (Nq + 2 * Nk) * D * 2 + 2 * win * D * 4     # q/k/v bf16 + skip/out f32
    lt = _choose_window_tile(L, win, per_window)
    num_l = L // lt

    block_bytes = lt * per_window
    vmem_limit = int(min(max(4 * block_bytes + (8 << 20), 32 << 20), 64 << 20))

    flops = (2 * b * L * ((Nq + 2 * Nk) * D * hd + 2 * heads * Nq * Nk * dim_head)
             + 2 * b * L * win * hd * D)
    transc = b * L * heads * Nq * Nk
    bytes_accessed = int(2 * (q_r.size + k_r.size + v_r.size)
                         + 4 * (skip_r.size + b * L * win * D)
                         + 2 * (w_qkv.size + w_p.size)
                         + 4 * (b_qkv.size + b_p.size + ln_g.size + ln_b.size))

    kern = partial(_cross_win_attn_kernel, heads=heads, dim_head=dim_head,
                   n_views=n, win=win, Lt=lt, Nq=Nq, Nk=Nk, D=D)

    const3 = lambda i, l: (0, 0, 0)
    out = pl.pallas_call(
        kern,
        out_shape=jax.ShapeDtypeStruct((b, L * win, D), jnp.float32),
        grid=(b, num_l),
        in_specs=[
            pl.BlockSpec((1, lt, Nq, D), lambda i, l: (i, l, 0, 0)),   # q (bf16)
            pl.BlockSpec((1, lt, Nk, D), lambda i, l: (i, l, 0, 0)),   # k (bf16)
            pl.BlockSpec((1, lt, Nk, D), lambda i, l: (i, l, 0, 0)),   # v (bf16)
            pl.BlockSpec((1, lt * win, D), lambda i, l: (i, l, 0)),    # skip (f32)
            pl.BlockSpec((3, 1, D), const3),                           # ln_g
            pl.BlockSpec((3, 1, D), const3),                           # ln_b
            pl.BlockSpec((3, D, hd), const3),                          # w_qkv (q pre-scaled)
            pl.BlockSpec((3, 1, hd), const3),                          # b_qkv
            pl.BlockSpec((hd, D), lambda i, l: (0, 0)),                # w_p (1/n folded)
            pl.BlockSpec((1, D), lambda i, l: (0, 0)),                 # b_p
        ],
        out_specs=pl.BlockSpec((1, lt * win, D), lambda i, l: (i, l, 0)),
        compiler_params=pltpu.CompilerParams(
            dimension_semantics=("parallel", "parallel"),
            vmem_limit_bytes=vmem_limit),
        cost_estimate=pl.CostEstimate(flops=int(flops),
                                      transcendentals=int(transc),
                                      bytes_accessed=bytes_accessed),
    )(q_r, k_r, v_r, skip_r, ln_g, ln_b, w_qkv, b_qkv, w_p, b_p)

    return out.reshape(b, X, Y, W1, W2, D)


def reference(q, k, v, params, heads, dim_head, skip=None):
    """Pure-JAX (f32) transcription of the PyTorch forward (for verification)."""
    b, n, X, Y, W1, W2, D = q.shape
    _, _, xh, yw, w1, w2, _ = k.shape
    scale = dim_head ** (-0.5)

    def to_blnd(t, hh, ww, wh, wwid):
        t = jnp.transpose(t, (0, 2, 3, 1, 4, 5, 6))
        return t.reshape(t.shape[0], hh * ww, n * wh * wwid, D)

    q_r = to_blnd(q, X, Y, W1, W2)
    k_r = to_blnd(k, xh, yw, w1, w2)
    v_r = to_blnd(v, xh, yw, w1, w2)

    def lnlin(x, idx):
        g = params["ln_g"][idx, 0]
        bta = params["ln_b"][idx, 0]
        mu = x.mean(-1, keepdims=True)
        var = ((x - mu) ** 2).mean(-1, keepdims=True)
        xn = (x - mu) / jnp.sqrt(var + 1e-5) * g + bta
        return xn @ params["w_qkv"][idx] + params["b_qkv"][idx, 0]

    qq, kk, vv = lnlin(q_r, 0), lnlin(k_r, 1), lnlin(v_r, 2)

    def split(t):
        bsz, L, N, _ = t.shape
        t = t.reshape(bsz, L, N, heads, dim_head)
        return jnp.transpose(t, (0, 3, 1, 2, 4)).reshape(bsz * heads, L, N, dim_head)

    qh, kh, vh = split(qq), split(kk), split(vv)
    dot = scale * jnp.einsum('blqd,blkd->blqk', qh, kh)
    att = jax.nn.softmax(dot, axis=-1)
    a = jnp.einsum('blqk,blkd->blqd', att, vh)
    L = X * Y
    Nq = n * W1 * W2
    a = a.reshape(b, heads, L, Nq, dim_head)
    a = jnp.transpose(a, (0, 2, 3, 1, 4)).reshape(b, L, Nq, heads * dim_head)
    z = a @ params["w_p"] + params["b_p"][0]
    z = z.reshape(b, X, Y, n, W1, W2, D)
    z = jnp.transpose(z, (0, 3, 1, 2, 4, 5, 6))   # b n X Y W1 W2 d
    z = z.mean(axis=1)
    if skip is not None:
        z = z + skip
    return z


if __name__ == "__main__":
    key = jax.random.PRNGKey(0)
    b, n = 2, 2
    X, Y, W1, W2 = 2, 2, 4, 4
    xh, yw, w1, w2 = 2, 2, 4, 4          # X*Y == x*y
    dim, heads, dim_head = 32, 2, 16
    hd = heads * dim_head

    ks = jax.random.split(key, 8)
    q = jax.random.normal(ks[0], (b, n, X, Y, W1, W2, dim), jnp.float32)
    k = jax.random.normal(ks[1], (b, n, xh, yw, w1, w2, dim), jnp.float32)
    v = jax.random.normal(ks[2], (b, n, xh, yw, w1, w2, dim), jnp.float32)
    skip = jax.random.normal(ks[3], (b, X, Y, W1, W2, dim), jnp.float32)

    params = dict(
        ln_g=jnp.ones((3, 1, dim), jnp.float32),        # LayerNorm weight (q,k,v)
        ln_b=jnp.zeros((3, 1, dim), jnp.float32),       # LayerNorm bias   (q,k,v)
        w_qkv=0.1 * jax.random.normal(ks[4], (3, dim, hd), jnp.float32),
        b_qkv=0.1 * jax.random.normal(ks[5], (3, 1, hd), jnp.float32),   # qkv_bias=True
        w_p=0.1 * jax.random.normal(ks[6], (hd, dim), jnp.float32),
        b_p=0.1 * jax.random.normal(ks[7], (1, dim), jnp.float32),
    )

    out = cross_win_attention(q, k, v, params, heads=heads, dim_head=dim_head, skip=skip)
    out = jax.block_until_ready(out)

    ref = reference(q, k, v, params, heads, dim_head, skip=skip)
    assert out.shape == (b, X, Y, W1, W2, dim), out.shape
    max_err = float(jnp.max(jnp.abs(out - ref)))
    assert jnp.allclose(out, ref, atol=2e-2, rtol=2e-2), max_err
    print("KERNEL_OK")
</pallas_src>

<mosaic_0001>
module attributes {stable_mosaic.version = 11 : i64} {
  func.func @_cross_win_attn_kernel(%arg0: i32, %arg1: i32, %arg2: memref<1x2x32x32xbf16, #tpu.memory_space<vmem>>, %arg3: memref<1x2x32x32xbf16, #tpu.memory_space<vmem>>, %arg4: memref<1x2x32x32xbf16, #tpu.memory_space<vmem>>, %arg5: memref<1x32x32xf32, #tpu.memory_space<vmem>>, %arg6: memref<3x1x32xf32, #tpu.memory_space<vmem>>, %arg7: memref<3x1x32xf32, #tpu.memory_space<vmem>>, %arg8: memref<3x32x32xbf16, #tpu.memory_space<vmem>>, %arg9: memref<3x1x32xf32, #tpu.memory_space<vmem>>, %arg10: memref<32x32xbf16, #tpu.memory_space<vmem>>, %arg11: memref<1x32xf32, #tpu.memory_space<vmem>>, %arg12: memref<1x32x32xf32, #tpu.memory_space<vmem>>) attributes {dimension_semantics = [#tpu.dimension_semantics<parallel>, #tpu.dimension_semantics<parallel>], iteration_bounds = array<i64: 2, 2>, scalar_prefetch = 0 : i64, scratch_operands = 0 : i64, tpu.core_type = #tpu.core_type<tc>, window_params = [{transform_indices = @transform_0, window_bounds = array<i64: 1, 2, 32, 32>}, {transform_indices = @transform_1, window_bounds = array<i64: 1, 2, 32, 32>}, {transform_indices = @transform_2, window_bounds = array<i64: 1, 2, 32, 32>}, {transform_indices = @transform_3, window_bounds = array<i64: 1, 32, 32>}, {pipeline_mode = #tpu.pipeline_mode<synchronous>, transform_indices = @transform_4, window_bounds = array<i64: 3, 1, 32>}, {pipeline_mode = #tpu.pipeline_mode<synchronous>, transform_indices = @transform_5, window_bounds = array<i64: 3, 1, 32>}, {pipeline_mode = #tpu.pipeline_mode<synchronous>, transform_indices = @transform_6, window_bounds = array<i64: 3, 32, 32>}, {pipeline_mode = #tpu.pipeline_mode<synchronous>, transform_indices = @transform_7, window_bounds = array<i64: 3, 1, 32>}, {pipeline_mode = #tpu.pipeline_mode<synchronous>, transform_indices = @transform_8, window_bounds = array<i64: 32, 32>}, {pipeline_mode = #tpu.pipeline_mode<synchronous>, transform_indices = @transform_9, window_bounds = array<i64: 1, 32>}, {transform_indices = @transform_10, window_bounds = array<i64: 1, 32, 32>}]} {
    %c0 = arith.constant 0 : index
    %c0_0 = arith.constant 0 : index
    %c0_1 = arith.constant 0 : index
    %c0_2 = arith.constant 0 : index
    %0 = vector.load %arg2[%c0, %c0_0, %c0_1, %c0_2] : memref<1x2x32x32xbf16, #tpu.memory_space<vmem>>, vector<1x2x32x32xbf16>
    %1 = vector.shape_cast %0 : vector<1x2x32x32xbf16> to vector<2x32x32xbf16>
    %2 = vector.shape_cast %1 : vector<2x32x32xbf16> to vector<64x32xbf16>
    %3 = arith.extf %2 : vector<64x32xbf16> to vector<64x32xf32>
    %cst = arith.constant dense<0.000000e+00> : vector<64xf32>
    %4 = vector.multi_reduction <add>, %3, %cst [1] : vector<64x32xf32> to vector<64xf32>
    %5 = vector.shape_cast %4 : vector<64xf32> to vector<64x1xf32>
    %cst_3 = arith.constant 3.200000e+01 : f32
    %6 = vector.broadcast %cst_3 : f32 to vector<64x1xf32>
    %7 = arith.divf %5, %6 : vector<64x1xf32>
    %8 = vector.broadcast %7 : vector<64x1xf32> to vector<64x32xf32>
    %9 = arith.subf %3, %8 : vector<64x32xf32>
    %10 = arith.mulf %9, %9 : vector<64x32xf32>
    %cst_4 = arith.constant dense<0.000000e+00> : vector<64xf32>
    %11 = vector.multi_reduction <add>, %10, %cst_4 [1] : vector<64x32xf32> to vector<64xf32>
    %12 = vector.shape_cast %11 : vector<64xf32> to vector<64x1xf32>
    %cst_5 = arith.constant 3.200000e+01 : f32
    %13 = vector.broadcast %cst_5 : f32 to vector<64x1xf32>
    %14 = arith.divf %12, %13 : vector<64x1xf32>
    %15 = vector.broadcast %7 : vector<64x1xf32> to vector<64x32xf32>
    %16 = arith.subf %3, %15 : vector<64x32xf32>
    %cst_6 = arith.constant 9.99999974E-6 : f32
    %17 = vector.broadcast %cst_6 : f32 to vector<64x1xf32>
    %18 = arith.addf %14, %17 : vector<64x1xf32>
    %19 = math.rsqrt %18 : vector<64x1xf32>
    %20 = vector.broadcast %19 : vector<64x1xf32> to vector<64x32xf32>
    %21 = arith.mulf %16, %20 : vector<64x32xf32>
    %c0_7 = arith.constant 0 : index
    %c0_8 = arith.constant 0 : index
    %c0_9 = arith.constant 0 : index
    %22 = vector.load %arg6[%c0_7, %c0_8, %c0_9] : memref<3x1x32xf32, #tpu.memory_space<vmem>>, vector<1x1x32xf32>
    %23 = vector.shape_cast %22 : vector<1x1x32xf32> to vector<1x32xf32>
    %24 = vector.broadcast %23 : vector<1x32xf32> to vector<64x32xf32>
    %25 = arith.mulf %21, %24 : vector<64x32xf32>
    %c0_10 = arith.constant 0 : index
    %c0_11 = arith.constant 0 : index
    %c0_12 = arith.constant 0 : index
    %26 = vector.load %arg7[%c0_10, %c0_11, %c0_12] : memref<3x1x32xf32, #tpu.memory_space<vmem>>, vector<1x1x32xf32>
    %27 = vector.shape_cast %26 : vector<1x1x32xf32> to vector<1x32xf32>
    %28 = vector.broadcast %27 : vector<1x32xf32> to vector<64x32xf32>
    %29 = arith.addf %25, %28 : vector<64x32xf32>
    %30 = arith.truncf %29 : vector<64x32xf32> to vector<64x32xbf16>
    %c0_13 = arith.constant 0 : index
    %c0_14 = arith.constant 0 : index
    %c0_15 = arith.constant 0 : index
    %c0_16 = arith.constant 0 : index
    %31 = vector.load %arg3[%c0_13, %c0_14, %c0_15, %c0_16] : memref<1x2x32x32xbf16, #tpu.memory_space<vmem>>, vector<1x2x32x32xbf16>
    %32 = vector.shape_cast %31 : vector<1x2x32x32xbf16> to vector<2x32x32xbf16>
    %33 = vector.shape_cast %32 : vector<2x32x32xbf16> to vector<64x32xbf16>
    %34 = arith.extf %33 : vector<64x32xbf16> to vector<64x32xf32>
    %cst_17 = arith.constant dense<0.000000e+00> : vector<64xf32>
    %35 = vector.multi_reduction <add>, %34, %cst_17 [1] : vector<64x32xf32> to vector<64xf32>
    %36 = vector.shape_cast %35 : vector<64xf32> to vector<64x1xf32>
    %cst_18 = arith.constant 3.200000e+01 : f32
    %37 = vector.broadcast %cst_18 : f32 to vector<64x1xf32>
    %38 = arith.divf %36, %37 : vector<64x1xf32>
    %39 = vector.broadcast %38 : vector<64x1xf32> to vector<64x32xf32>
    %40 = arith.subf %34, %39 : vector<64x32xf32>
    %41 = arith.mulf %40, %40 : vector<64x32xf32>
    %cst_19 = arith.constant dense<0.000000e+00> : vector<64xf32>
    %42 = vector.multi_reduction <add>, %41, %cst_19 [1] : vector<64x32xf32> to vector<64xf32>
    %43 = vector.shape_cast %42 : vector<64xf32> to vector<64x1xf32>
    %cst_20 = arith.constant 3.200000e+01 : f32
    %44 = vector.broadcast %cst_20 : f32 to vector<64x1xf32>
    %45 = arith.divf %43, %44 : vector<64x1xf32>
    %46 = vector.broadcast %38 : vector<64x1xf32> to vector<64x32xf32>
    %47 = arith.subf %34, %46 : vector<64x32xf32>
    %cst_21 = arith.constant 9.99999974E-6 : f32
    %48 = vector.broadcast %cst_21 : f32 to vector<64x1xf32>
    %49 = arith.addf %45, %48 : vector<64x1xf32>
    %50 = math.rsqrt %49 : vector<64x1xf32>
    %51 = vector.broadcast %50 : vector<64x1xf32> to vector<64x32xf32>
    %52 = arith.mulf %47, %51 : vector<64x32xf32>
    %c1 = arith.constant 1 : index
    %c0_22 = arith.constant 0 : index
    %c0_23 = arith.constant 0 : index
    %53 = vector.load %arg6[%c1, %c0_22, %c0_23] : memref<3x1x32xf32, #tpu.memory_space<vmem>>, vector<1x1x32xf32>
    %54 = vector.shape_cast %53 : vector<1x1x32xf32> to vector<1x32xf32>
    %55 = vector.broadcast %54 : vector<1x32xf32> to vector<64x32xf32>
    %56 = arith.mulf %52, %55 : vector<64x32xf32>
    %c1_24 = arith.constant 1 : index
    %c0_25 = arith.constant 0 : index
    %c0_26 = arith.constant 0 : index
    %57 = vector.load %arg7[%c1_24, %c0_25, %c0_26] : memref<3x1x32xf32, #tpu.memory_space<vmem>>, vector<1x1x32xf32>
    %58 = vector.shape_cast %57 : vector<1x1x32xf32> to vector<1x32xf32>
    %59 = vector.broadcast %58 : vector<1x32xf32> to vector<64x32xf32>
    %60 = arith.addf %56, %59 : vector<64x32xf32>
    %61 = arith.truncf %60 : vector<64x32xf32> to vector<64x32xbf16>
    %c0_27 = arith.constant 0 : index
    %c0_28 = arith.constant 0 : index
    %c0_29 = arith.constant 0 : index
    %c0_30 = arith.constant 0 : index
    %62 = vector.load %arg4[%c0_27, %c0_28, %c0_29, %c0_30] : memref<1x2x32x32xbf16, #tpu.memory_space<vmem>>, vector<1x2x32x32xbf16>
    %63 = vector.shape_cast %62 : vector<1x2x32x32xbf16> to vector<2x32x32xbf16>
    %64 = vector.shape_cast %63 : vector<2x32x32xbf16> to vector<64x32xbf16>
    %65 = arith.extf %64 : vector<64x32xbf16> to vector<64x32xf32>
    %cst_31 = arith.constant dense<0.000000e+00> : vector<64xf32>
    %66 = vector.multi_reduction <add>, %65, %cst_31 [1] : vector<64x32xf32> to vector<64xf32>
    %67 = vector.shape_cast %66 : vector<64xf32> to vector<64x1xf32>
    %cst_32 = arith.constant 3.200000e+01 : f32
    %68 = vector.broadcast %cst_32 : f32 to vector<64x1xf32>
    %69 = arith.divf %67, %68 : vector<64x1xf32>
    %70 = vector.broadcast %69 : vector<64x1xf32> to vector<64x32xf32>
    %71 = arith.subf %65, %70 : vector<64x32xf32>
    %72 = arith.mulf %71, %71 : vector<64x32xf32>
    %cst_33 = arith.constant dense<0.000000e+00> : vector<64xf32>
    %73 = vector.multi_reduction <add>, %72, %cst_33 [1] : vector<64x32xf32> to vector<64xf32>
    %74 = vector.shape_cast %73 : vector<64xf32> to vector<64x1xf32>
    %cst_34 = arith.constant 3.200000e+01 : f32
    %75 = vector.broadcast %cst_34 : f32 to vector<64x1xf32>
    %76 = arith.divf %74, %75 : vector<64x1xf32>
    %77 = vector.broadcast %69 : vector<64x1xf32> to vector<64x32xf32>
    %78 = arith.subf %65, %77 : vector<64x32xf32>
    %cst_35 = arith.constant 9.99999974E-6 : f32
    %79 = vector.broadcast %cst_35 : f32 to vector<64x1xf32>
    %80 = arith.addf %76, %79 : vector<64x1xf32>
    %81 = math.rsqrt %80 : vector<64x1xf32>
    %82 = vector.broadcast %81 : vector<64x1xf32> to vector<64x32xf32>
    %83 = arith.mulf %78, %82 : vector<64x32xf32>
    %c2 = arith.constant 2 : index
    %c0_36 = arith.constant 0 : index
    %c0_37 = arith.constant 0 : index
    %84 = vector.load %arg6[%c2, %c0_36, %c0_37] : memref<3x1x32xf32, #tpu.memory_space<vmem>>, vector<1x1x32xf32>
    %85 = vector.shape_cast %84 : vector<1x1x32xf32> to vector<1x32xf32>
    %86 = vector.broadcast %85 : vector<1x32xf32> to vector<64x32xf32>
    %87 = arith.mulf %83, %86 : vector<64x32xf32>
    %c2_38 = arith.constant 2 : index
    %c0_39 = arith.constant 0 : index
    %c0_40 = arith.constant 0 : index
    %88 = vector.load %arg7[%c2_38, %c0_39, %c0_40] : memref<3x1x32xf32, #tpu.memory_space<vmem>>, vector<1x1x32xf32>
    %89 = vector.shape_cast %88 : vector<1x1x32xf32> to vector<1x32xf32>
    %90 = vector.broadcast %89 : vector<1x32xf32> to vector<64x32xf32>
    %91 = arith.addf %87, %90 : vector<64x32xf32>
    %92 = arith.truncf %91 : vector<64x32xf32> to vector<64x32xbf16>
    %c0_41 = arith.constant 0 : index
    %c0_42 = arith.constant 0 : index
    %c0_43 = arith.constant 0 : index
    %93 = vector.load %arg8[%c0_41, %c0_42, %c0_43] : memref<3x32x32xbf16, #tpu.memory_space<vmem>>, vector<1x32x32xbf16>
    %94 = vector.shape_cast %93 : vector<1x32x32xbf16> to vector<32x32xbf16>
    %cst_44 = arith.constant dense<0.000000e+00> : vector<64x32xf32>
    %95 = tpu.matmul %30, %94, %cst_44 {dimension_numbers = #tpu.dot_dimension_numbers<[1], [0], [0], [1], [0, 0, 1, 1], [], []>} : vector<64x32xbf16>, vector<32x32xbf16>, vector<64x32xf32> -> vector<64x32xf32>
    %c0_45 = arith.constant 0 : index
    %c0_46 = arith.constant 0 : index
    %c0_47 = arith.constant 0 : index
    %96 = vector.load %arg9[%c0_45, %c0_46, %c0_47] : memref<3x1x32xf32, #tpu.memory_space<vmem>>, vector<1x1x32xf32>
    %97 = vector.shape_cast %96 : vector<1x1x32xf32> to vector<1x32xf32>
    %98 = vector.broadcast %97 : vector<1x32xf32> to vector<64x32xf32>
    %99 = arith.addf %95, %98 : vector<64x32xf32>
    %100 = arith.truncf %99 : vector<64x32xf32> to vector<64x32xbf16>
    %c1_48 = arith.constant 1 : index
    %c0_49 = arith.constant 0 : index
    %c0_50 = arith.constant 0 : index
    %101 = vector.load %arg8[%c1_48, %c0_49, %c0_50] : memref<3x32x32xbf16, #tpu.memory_space<vmem>>, vector<1x32x32xbf16>
    %102 = vector.shape_cast %101 : vector<1x32x32xbf16> to vector<32x32xbf16>
    %cst_51 = arith.constant dense<0.000000e+00> : vector<64x32xf32>
    %103 = tpu.matmul %61, %102, %cst_51 {dimension_numbers = #tpu.dot_dimension_numbers<[1], [0], [0], [1], [0, 0, 1, 1], [], []>} : vector<64x32xbf16>, vector<32x32xbf16>, vector<64x32xf32> -> vector<64x32xf32>
    %c1_52 = arith.constant 1 : index
    %c0_53 = arith.constant 0 : index
    %c0_54 = arith.constant 0 : index
    %104 = vector.load %arg9[%c1_52, %c0_53, %c0_54] : memref<3x1x32xf32, #tpu.memory_space<vmem>>, vector<1x1x32xf32>
    %105 = vector.shape_cast %104 : vector<1x1x32xf32> to vector<1x32xf32>
    %106 = vector.broadcast %105 : vector<1x32xf32> to vector<64x32xf32>
    %107 = arith.addf %103, %106 : vector<64x32xf32>
    %108 = arith.truncf %107 : vector<64x32xf32> to vector<64x32xbf16>
    %c2_55 = arith.constant 2 : index
    %c0_56 = arith.constant 0 : index
    %c0_57 = arith.constant 0 : index
    %109 = vector.load %arg8[%c2_55, %c0_56, %c0_57] : memref<3x32x32xbf16, #tpu.memory_space<vmem>>, vector<1x32x32xbf16>
    %110 = vector.shape_cast %109 : vector<1x32x32xbf16> to vector<32x32xbf16>
    %cst_58 = arith.constant dense<0.000000e+00> : vector<64x32xf32>
    %111 = tpu.matmul %92, %110, %cst_58 {dimension_numbers = #tpu.dot_dimension_numbers<[1], [0], [0], [1], [0, 0, 1, 1], [], []>} : vector<64x32xbf16>, vector<32x32xbf16>, vector<64x32xf32> -> vector<64x32xf32>
    %c2_59 = arith.constant 2 : index
    %c0_60 = arith.constant 0 : index
    %c0_61 = arith.constant 0 : index
    %112 = vector.load %arg9[%c2_59, %c0_60, %c0_61] : memref<3x1x32xf32, #tpu.memory_space<vmem>>, vector<1x1x32xf32>
    %113 = vector.shape_cast %112 : vector<1x1x32xf32> to vector<1x32xf32>
    %114 = vector.broadcast %113 : vector<1x32xf32> to vector<64x32xf32>
    %115 = arith.addf %111, %114 : vector<64x32xf32>
    %116 = arith.truncf %115 : vector<64x32xf32> to vector<64x32xbf16>
    %117 = vector.extract_strided_slice %100 {offsets = [0, 0], sizes = [64, 16], strides = [1, 1]} : vector<64x32xbf16> to vector<64x16xbf16>
    %118 = vector.shape_cast %117 : vector<64x16xbf16> to vector<2x32x16xbf16>
    %119 = vector.extract_strided_slice %108 {offsets = [0, 0], sizes = [64, 16], strides = [1, 1]} : vector<64x32xbf16> to vector<64x16xbf16>
    %120 = vector.shape_cast %119 : vector<64x16xbf16> to vector<2x32x16xbf16>
    %121 = vector.extract_strided_slice %116 {offsets = [0, 0], sizes = [64, 16], strides = [1, 1]} : vector<64x32xbf16> to vector<64x16xbf16>
    %122 = vector.shape_cast %121 : vector<64x16xbf16> to vector<2x32x16xbf16>
    "tpu.trace_start"() <{level = 10 : i32, message = "lqd,lkd->lqk"}> : () -> ()
    %cst_62 = arith.constant dense<0.000000e+00> : vector<2x32x32xf32>
    %123 = tpu.matmul %118, %120, %cst_62 {dimension_numbers = #tpu.dot_dimension_numbers<[2], [2], [1], [1], [0, 0, 0, 1, 1, 1], [0], [0]>} : vector<2x32x16xbf16>, vector<2x32x16xbf16>, vector<2x32x32xf32> -> vector<2x32x32xf32>
    "tpu.trace_stop"() : () -> ()
    %cst_63 = arith.constant dense<0xFF800000> : vector<2x32xf32>
    %124 = vector.multi_reduction <maximumf>, %123, %cst_63 [2] : vector<2x32x32xf32> to vector<2x32xf32>
    %125 = vector.shape_cast %124 : vector<2x32xf32> to vector<2x32x1xf32>
    %126 = vector.broadcast %125 : vector<2x32x1xf32> to vector<2x32x32xf32>
    %127 = arith.subf %123, %126 : vector<2x32x32xf32>
    %128 = math.exp %127 : vector<2x32x32xf32>
    %cst_64 = arith.constant dense<0.000000e+00> : vector<2x32xf32>
    %129 = vector.multi_reduction <add>, %128, %cst_64 [2] : vector<2x32x32xf32> to vector<2x32xf32>
    %130 = vector.shape_cast %129 : vector<2x32xf32> to vector<2x32x1xf32>
    %131 = tpu.reciprocal %130 {approx = true} : vector<2x32x1xf32> -> vector<2x32x1xf32>
    %132 = vector.broadcast %131 : vector<2x32x1xf32> to vector<2x32x32xf32>
    %133 = arith.mulf %128, %132 : vector<2x32x32xf32>
    %134 = arith.truncf %133 : vector<2x32x32xf32> to vector<2x32x32xbf16>
    "tpu.trace_start"() <{level = 10 : i32, message = "lqk,lkd->lqd"}> : () -> ()
    %cst_65 = arith.constant dense<0.000000e+00> : vector<2x32x16xf32>
    %135 = tpu.matmul %134, %122, %cst_65 {dimension_numbers = #tpu.dot_dimension_numbers<[2], [1], [1], [2], [0, 0, 0, 1, 1, 2], [0], [0]>} : vector<2x32x32xbf16>, vector<2x32x16xbf16>, vector<2x32x16xf32> -> vector<2x32x16xf32>
    "tpu.trace_stop"() : () -> ()
    %136 = vector.extract_strided_slice %100 {offsets = [0, 16], sizes = [64, 16], strides = [1, 1]} : vector<64x32xbf16> to vector<64x16xbf16>
    %137 = vector.shape_cast %136 : vector<64x16xbf16> to vector<2x32x16xbf16>
    %138 = vector.extract_strided_slice %108 {offsets = [0, 16], sizes = [64, 16], strides = [1, 1]} : vector<64x32xbf16> to vector<64x16xbf16>
    %139 = vector.shape_cast %138 : vector<64x16xbf16> to vector<2x32x16xbf16>
    %140 = vector.extract_strided_slice %116 {offsets = [0, 16], sizes = [64, 16], strides = [1, 1]} : vector<64x32xbf16> to vector<64x16xbf16>
    %141 = vector.shape_cast %140 : vector<64x16xbf16> to vector<2x32x16xbf16>
    "tpu.trace_start"() <{level = 10 : i32, message = "lqd,lkd->lqk"}> : () -> ()
    %cst_66 = arith.constant dense<0.000000e+00> : vector<2x32x32xf32>
    %142 = tpu.matmul %137, %139, %cst_66 {dimension_numbers = #tpu.dot_dimension_numbers<[2], [2], [1], [1], [0, 0, 0, 1, 1, 1], [0], [0]>} : vector<2x32x16xbf16>, vector<2x32x16xbf16>, vector<2x32x32xf32> -> vector<2x32x32xf32>
    "tpu.trace_stop"() : () -> ()
    %cst_67 = arith.constant dense<0xFF800000> : vector<2x32xf32>
    %143 = vector.multi_reduction <maximumf>, %142, %cst_67 [2] : vector<2x32x32xf32> to vector<2x32xf32>
    %144 = vector.shape_cast %143 : vector<2x32xf32> to vector<2x32x1xf32>
    %145 = vector.broadcast %144 : vector<2x32x1xf32> to vector<2x32x32xf32>
    %146 = arith.subf %142, %145 : vector<2x32x32xf32>
    %147 = math.exp %146 : vector<2x32x32xf32>
    %cst_68 = arith.constant dense<0.000000e+00> : vector<2x32xf32>
    %148 = vector.multi_reduction <add>, %147, %cst_68 [2] : vector<2x32x32xf32> to vector<2x32xf32>
    %149 = vector.shape_cast %148 : vector<2x32xf32> to vector<2x32x1xf32>
    %150 = tpu.reciprocal %149 {approx = true} : vector<2x32x1xf32> -> vector<2x32x1xf32>
    %151 = vector.broadcast %150 : vector<2x32x1xf32> to vector<2x32x32xf32>
    %152 = arith.mulf %147, %151 : vector<2x32x32xf32>
    %153 = arith.truncf %152 : vector<2x32x32xf32> to vector<2x32x32xbf16>
    "tpu.trace_start"() <{level = 10 : i32, message = "lqk,lkd->lqd"}> : () -> ()
    %cst_69 = arith.constant dense<0.000000e+00> : vector<2x32x16xf32>
    %154 = tpu.matmul %153, %141, %cst_69 {dimension_numbers = #tpu.dot_dimension_numbers<[2], [1], [1], [2], [0, 0, 0, 1, 1, 2], [0], [0]>} : vector<2x32x32xbf16>, vector<2x32x16xbf16>, vector<2x32x16xf32> -> vector<2x32x16xf32>
    "tpu.trace_stop"() : () -> ()
    %155 = tpu.concatenate %135, %154 in 2 : vector<2x32x16xf32>, vector<2x32x16xf32> -> vector<2x32x32xf32>
    %156 = vector.shape_cast %155 : vector<2x32x32xf32> to vector<2x2x16x32xf32>
    %cst_70 = arith.constant dense<0.000000e+00> : vector<2x16x32xf32>
    %157 = vector.multi_reduction <add>, %156, %cst_70 [1] : vector<2x2x16x32xf32> to vector<2x16x32xf32>
    %158 = vector.shape_cast %157 : vector<2x16x32xf32> to vector<32x32xf32>
    %159 = arith.truncf %158 : vector<32x32xf32> to vector<32x32xbf16>
    %c0_71 = arith.constant 0 : index
    %c0_72 = arith.constant 0 : index
    %160 = vector.load %arg10[%c0_71, %c0_72] : memref<32x32xbf16, #tpu.memory_space<vmem>>, vector<32x32xbf16>
    %cst_73 = arith.constant dense<0.000000e+00> : vector<32x32xf32>
    %161 = tpu.matmul %159, %160, %cst_73 {dimension_numbers = #tpu.dot_dimension_numbers<[1], [0], [0], [1], [0, 0, 1, 1], [], []>} : vector<32x32xbf16>, vector<32x32xbf16>, vector<32x32xf32> -> vector<32x32xf32>
    %c0_74 = arith.constant 0 : index
    %c0_75 = arith.constant 0 : index
    %162 = vector.load %arg11[%c0_74, %c0_75] : memref<1x32xf32, #tpu.memory_space<vmem>>, vector<1x32xf32>
    %163 = vector.broadcast %162 : vector<1x32xf32> to vector<32x32xf32>
    %164 = arith.addf %161, %163 : vector<32x32xf32>
    %c0_76 = arith.constant 0 : index
    %c0_77 = arith.constant 0 : index
    %c0_78 = arith.constant 0 : index
    %165 = vector.load %arg5[%c0_76, %c0_77, %c0_78] : memref<1x32x32xf32, #tpu.memory_space<vmem>>, vector<1x32x32xf32>
    %166 = vector.shape_cast %165 : vector<1x32x32xf32> to vector<32x32xf32>
    %167 = arith.addf %164, %166 : vector<32x32xf32>
    %c0_79 = arith.constant 0 : index
    %c0_80 = arith.constant 0 : index
    %c0_81 = arith.constant 0 : index
    %168 = vector.load %arg12[%c0_79, %c0_80, %c0_81] : memref<1x32x32xf32, #tpu.memory_space<vmem>>, vector<1x32x32xf32>
    %169 = vector.shape_cast %168 : vector<1x32x32xf32> to vector<32x32xf32>
    %170 = vector.shape_cast %167 : vector<32x32xf32> to vector<1x32x32xf32>
    tpu.vector_store %arg12[%c0_79, %c0_80, %c0_81], %170 {strides = array<i32>} : memref<1x32x32xf32, #tpu.memory_space<vmem>>, vector<1x32x32xf32>,
    return
  }
  func.func @transform_0(%arg0: i32, %arg1: i32) -> (i32, i32, i32, i32) {
    %c0_i32 = arith.constant 0 : i32
    %c0_i32_0 = arith.constant 0 : i32
    %c0_i32_1 = arith.constant 0 : i32
    return %arg0, %arg1, %c0_i32, %c0_i32_0 : i32, i32, i32, i32
  }
  func.func @transform_1(%arg0: i32, %arg1: i32) -> (i32, i32, i32, i32) {
    %c0_i32 = arith.constant 0 : i32
    %c0_i32_0 = arith.constant 0 : i32
    %c0_i32_1 = arith.constant 0 : i32
    return %arg0, %arg1, %c0_i32, %c0_i32_0 : i32, i32, i32, i32
  }
  func.func @transform_2(%arg0: i32, %arg1: i32) -> (i32, i32, i32, i32) {
    %c0_i32 = arith.constant 0 : i32
    %c0_i32_0 = arith.constant 0 : i32
    %c0_i32_1 = arith.constant 0 : i32
    return %arg0, %arg1, %c0_i32, %c0_i32_0 : i32, i32, i32, i32
  }
  func.func @transform_3(%arg0: i32, %arg1: i32) -> (i32, i32, i32) {
    %c0_i32 = arith.constant 0 : i32
    %c0_i32_0 = arith.constant 0 : i32
    return %arg0, %arg1, %c0_i32 : i32, i32, i32
  }
  func.func @transform_4(%arg0: i32, %arg1: i32) -> (i32, i32, i32) {
    %c0_i32 = arith.constant 0 : i32
    %c0_i32_0 = arith.constant 0 : i32
    %c0_i32_1 = arith.constant 0 : i32
    %c0_i32_2 = arith.constant 0 : i32
    return %c0_i32, %c0_i32_0, %c0_i32_1 : i32, i32, i32
  }
  func.func @transform_5(%arg0: i32, %arg1: i32) -> (i32, i32, i32) {
    %c0_i32 = arith.constant 0 : i32
    %c0_i32_0 = arith.constant 0 : i32
    %c0_i32_1 = arith.constant 0 : i32
    %c0_i32_2 = arith.constant 0 : i32
    return %c0_i32, %c0_i32_0, %c0_i32_1 : i32, i32, i32
  }
  func.func @transform_6(%arg0: i32, %arg1: i32) -> (i32, i32, i32) {
    %c0_i32 = arith.constant 0 : i32
    %c0_i32_0 = arith.constant 0 : i32
    %c0_i32_1 = arith.constant 0 : i32
    %c0_i32_2 = arith.constant 0 : i32
    return %c0_i32, %c0_i32_0, %c0_i32_1 : i32, i32, i32
  }
  func.func @transform_7(%arg0: i32, %arg1: i32) -> (i32, i32, i32) {
    %c0_i32 = arith.constant 0 : i32
    %c0_i32_0 = arith.constant 0 : i32
    %c0_i32_1 = arith.constant 0 : i32
    %c0_i32_2 = arith.constant 0 : i32
    return %c0_i32, %c0_i32_0, %c0_i32_1 : i32, i32, i32
  }
  func.func @transform_8(%arg0: i32, %arg1: i32) -> (i32, i32) {
    %c0_i32 = arith.constant 0 : i32
    %c0_i32_0 = arith.constant 0 : i32
    %c0_i32_1 = arith.constant 0 : i32
    return %c0_i32, %c0_i32_0 : i32, i32
  }
  func.func @transform_9(%arg0: i32, %arg1: i32) -> (i32, i32) {
    %c0_i32 = arith.constant 0 : i32
    %c0_i32_0 = arith.constant 0 : i32
    %c0_i32_1 = arith.constant 0 : i32
    return %c0_i32, %c0_i32_0 : i32, i32
  }
  func.func @transform_10(%arg0: i32, %arg1: i32) -> (i32, i32, i32) {
    %c0_i32 = arith.constant 0 : i32
    %c0_i32_0 = arith.constant 0 : i32
    return %arg0, %arg1, %c0_i32 : i32, i32, i32
  }
}

</mosaic_0001>

<bundles_post_ra>
// kernel: cross_win_attention.1
= control target key start
LH: loop header
LB: loop body
LE: loop exit
PB: predicated region body
PF: predicated region fallthrough
CT: control target
= control target key end

     0   :  { %s3718_s0 = inlined_call_operand.vmem [shape: bf16[2,4,32,32], index: 0, kind: input, shape index: {}]   ;;  %s3719_s1 = inlined_call_operand.vmem [shape: bf16[2,4,32,32], index: 1, kind: input, shape index: {}]   ;;  %s3720_s2 = inlined_call_operand.vmem [shape: bf16[2,4,32,32], index: 2, kind: input, shape index: {}]   ;;  %s3721_s3 = inlined_call_operand.vmem [shape: f32[2,64,32], index: 3, kind: input, shape index: {}]   ;;  %s3722_s4 = inlined_call_operand.vmem [shape: f32[3,1,32], index: 4, kind: input, shape index: {}]   ;;  %s3723_s5 = inlined_call_operand.vmem [shape: f32[3,1,32], index: 5, kind: input, shape index: {}]   ;;  %s3724_s6 = inlined_call_operand.vmem [shape: bf16[3,32,32], index: 6, kind: input, shape index: {}]   ;;  %s3725_s7 = inlined_call_operand.vmem [shape: f32[3,1,32], index: 7, kind: input, shape index: {}]   ;;  %s3726_s8 = inlined_call_operand.vmem [shape: bf16[32,32], index: 8, kind: input, shape index: {}]   ;;  %s3727_s9 = inlined_call_operand.vmem [shape: f32[1,32], index: 9, kind: input, shape index: {}]   ;;  %s3728_s10 = inlined_call_operand.hbm [shape: f32[2,64,32], index: 10, kind: output, shape index: {}]  }
   0x1   :  { %3732 = sst [smem:[#allocation8_spill]] %s3718_s0 }
   0x2   :  { %3733 = sst [smem:[#allocation9_spill]] %s3719_s1 }
   0x3   :  { %3734 = sst [smem:[#allocation10_spill]] %s3720_s2 }
   0x4   :  { %3735 = sst [smem:[#allocation11_spill]] %s3722_s4 }
   0x5   :  { %15 = vsyncpa [#allocation3], 0 }
   0x6   :  { %17 = vsyncpa [#allocation3 + $0x1], 0  ;;  %s2950_s13 = smov 0   ;;  %s2952_s14 = smov 0  }
   0x7   :  { %s2954_s15 = smov 0   ;;  %s2956_s16 = smov 0  }
   0x8   :  { %s2958_s17 = smov 0   ;;  %s2960_s18 = smov 0  }
   0x9   :  { %s2962_s19 = smov 0   ;;  %s2964_s20 = smov 0  }
   0xa LB: > { %3736 = sst [smem:[#allocation5_spill]] %s2884_s19  ;;  %s2285_s21 = sadd.s32 4294967295, %s2888_s20   ;;  %s2888_s20 = sphi %s2964_s20, %s23_s20   ;;  %s2884_s19 = sphi %s2962_s19, %s3747_s19   ;;  %s2880_s18 = sphi %s2960_s18, %s3752_s18   ;;  %s2876_s17 = sphi %s2958_s17, %s3745_s17   ;;  %s2872_s16 = sphi %s2956_s16, %s3751_s16   ;;  %s2868_s15 = sphi %s2954_s15, %s3750_s15   ;;  %s2864_s14 = sphi %s2952_s14, %s3749_s14   ;;  %s2860_s13 = sphi %s2950_s13, %s3748_s13  }
   0xb   : > { %s2286_s22 = sadd.s32 4294967294, %s2888_s20   ;;  %s32_s23 = sadd.s32 1, %s2880_s18 }
   0xc   : > { %p33_p0 = scmp.ge.s32.totalorder %s32_s23, 2  ;;  %s35_s24 = sadd.s32 1, %s2884_s19 }
   0xd   : > { %p292_p1 = scmp.ne.s32.totalorder %s2868_s15, %s2864_s14  ;;  %p293_p2 = scmp.eq.s32.totalorder %s2285_s21, 3 }
   0xe   : > { %s3754_s23 = smov (%p33_p0, %s32_s23), 0  ;;  %s3756_s24 = smov (!%p33_p0, %s35_s24), %s2884_s19 }
   0xf   : > { %3737 = sst [smem:[#allocation6_spill]] %s3754_s23  ;;  %s278_s25 = ssub.s32 %s2880_s18, %s3754_s23 }
  0x10   : > { %p3001_p3 = por %p293_p2, %p292_p1  ;;  %p37_p4 = scmp.ge.s32.totalorder %s3756_s24, 2 }
  0x11   : > { %p298_p5 = scmp.ne.s32.totalorder %s2864_s14, %s2860_s13  ;;  %p299_p6 = scmp.eq.s32.totalorder %s2286_s22, 3 }
  0x12   : > { %p2289_p7 = scmp.ge.s32.totalorder %s2888_s20, 1  ;;  %s3758_s24 = smov (%p37_p4, %s3756_s24), 0 }
  0x13   : > { %3739 = sst [smem:[#allocation7_spill]] %s3758_s24  ;;  %p3010_p8 = por %p299_p6, %p298_p5 }
  0x14   : > { %p390_p9 = scmp.lt.s32.totalorder %s2888_s20, 5  ;;  %s277_s28 = ssub.s32 %s2884_s19, %s3758_s24 }
  0x15   : > { %s282_s29 = sadd.s32 1, %s2868_s15  ;;  %s279_s30 = sor.u32 %s278_s25, %s277_s28 }
  0x16   : > { %p391_p10 = pnand %p2289_p7, %p390_p9  ;;  %p280_p11 = scmp.eq.s32.totalorder %s279_s30, 0 }
  0x17   : > { %s2291_s12 = sshll.u32 (!%p391_p10), %s2872_s16, 1  ;;  %p463_p12 = scmp.lt.s32.totalorder (!%p391_p10), %s2876_s17, 1 }
  0x18   : > { %s3019_s11 = scalar_select %p280_p11, %s2868_s15, %s282_s29  }
  0x19   : > { %394 = sbr.rel (%p391_p10) target bundleno = 2270 (0x8de), region = 60  ;;  %p465_p13 = scmp.lt.s32.totalorder (!%p391_p10), %s2291_s12, 3 }
  0x1a   : > { %s3741_s1 = sld [smem:[#allocation9_spill]] (!%p391_p10) }
  0x1b   : > { %s3742_s0 = sld [smem:[#allocation8_spill]] (!%p391_p10) }
  0x1c   : > { %s3743_s2 = sld [smem:[#allocation10_spill]] (!%p391_p10) }
  0x1d   : > { %s3744_s4 = sld [smem:[#allocation11_spill]] (!%p391_p10) }
  0x1e   : > { %s3024_s21 = scalar_select %p463_p12, %s2876_s17, 1  ;;  %vm523_vm0 = vcmask 261120   ;;  %vm1291_vm1 = vcmask 130048  }
  0x1f   : > { %s3760_s12 = smov (!%p465_p13, %s2291_s12), 3 }
  0x20   : > { %s2293_s22 = sshll.u32 %s3024_s21, 4  ;;  %s2292_s23 = sshll.u32 %s3760_s12, 2 }
  0x21   : > { %s469_s24 = sadd.s32 %s2293_s22, %s2292_s23  ;;  %s2890_s23 = smov 112  }
  0x22   : > { %s3027_s19 = sshll.u32 %s469_s24, 2  ;;  %s2891_s24 = smov 16  }
  0x23   : > { %s482_s29 = scalar_lea.vmem %s3741_s1, %s3027_s19  ;;  %s471_s30 = scalar_lea.vmem %s3742_s0, %s3027_s19 }
  0x24   : > { %v3033_v0 = vld [vmem:[%s482_s29] sm:$0xff]   ;;  %v3035_v1 = vld [vmem:[%s482_s29 + $0x8] sm:$0xff]   ;;  %v3041_v6 = vld [vmem:[%s482_s29 + $0x10] sm:$0xff]   ;;  %s3204_s25 = scalar_lea.vmem %s3743_s2, %s3027_s19  ;;  %s2303_s19 = sshll.u32 %s2872_s16, 2 }
  0x25   : > { %v2392_v2 = vunpack.c.l.bf16 %v3033_v0  ;;  %v2396_v3 = vunpack.c.l.bf16 %v3035_v1  ;;  %v2393_v4 = vunpack.c.h.bf16 %v3033_v0  ;;  %v2397_v5 = vunpack.c.h.bf16 %v3035_v1  ;;  %v3053_v13 = vld [vmem:[%s482_s29 + $0x18] sm:$0xff]   ;;  %v3067_v18 = vld [vmem:[%s471_s30] sm:$0xff]   ;;  %v3077_v23 = vld [vmem:[%s471_s30 + $0x8] sm:$0xff]   ;;  %p498_p0 = scmp.lt.s32.totalorder %s2303_s19, 7  ;;  %s2304_s29 = sshll.u32 %s3024_s21, 3 }
  0x26   : > { %v2400_v11 = vunpack.c.l.bf16 %v3041_v6  ;;  %v2401_v12 = vunpack.c.h.bf16 %v3041_v6  ;;  %v2404_v16 = vunpack.c.l.bf16 %v3053_v13  ;;  %v2405_v17 = vunpack.c.h.bf16 %v3053_v13  ;;  %v3087_v28 = vld [vmem:[%s471_s30 + $0x10] sm:$0xff]   ;;  %v3097_v33 = vld [vmem:[%s471_s30 + $0x18] sm:$0xff]   ;;  %s459_s30 = sand.u32 1, %s2864_s14  }
  0x27   : > { %v679_v7 = vsel %vm523_vm0, %v2392_v2, 0.0  ;;  %v685_v8 = vsel %vm523_vm0, %v2396_v3, 0.0  ;;  %v682_v9 = vsel %vm523_vm0, %v2393_v4, 0.0  ;;  %v688_v10 = vsel %vm523_vm0, %v2397_v5, 0.0  ;;  %s499_s28 = scalar_select %p498_p0, %s2303_s19, 7 }
  0x28   : > { %680 = vadd.xlane.f32.xlu0 %v679_v7  ;;  %686 = vadd.xlane.f32.xlu1 %v685_v8  ;;  %v691_v14 = vsel %vm523_vm0, %v2400_v11, 0.0  ;;  %v694_v15 = vsel %vm523_vm0, %v2401_v12, 0.0  ;;  %v697_v19 = vsel %vm523_vm0, %v2404_v16, 0.0  ;;  %v700_v20 = vsel %vm523_vm0, %v2405_v17, 0.0  ;;  %s2290_s2 = sshll.u32 %s459_s30, 5 }
  0x29   : > { %v2376_v21 = vunpack.c.l.bf16 %v3067_v18  ;;  %v2377_v22 = vunpack.c.h.bf16 %v3067_v18  ;;  %v2380_v26 = vunpack.c.l.bf16 %v3077_v23  ;;  %v2381_v27 = vunpack.c.h.bf16 %v3077_v23  ;;  %s461_s21 = scalar_lea.vmem [#allocation2], %s2290_s2  ;;  %s3667_s2 = scalar_lea.sflag [#allocation3], %s459_s30 }
  0x2a   : > { %v2384_v31 = vunpack.c.l.bf16 %v3087_v28  ;;  %v2385_v32 = vunpack.c.h.bf16 %v3087_v28  ;;  %v2388_v36 = vunpack.c.l.bf16 %v3097_v33  ;;  %v2389_v37 = vunpack.c.h.bf16 %v3097_v33  ;;  %s2140_s0 = sshll.u32 %s461_s21, 4  ;;  %s3661_s0 = int_to_ptr.vmem [resolvable:$true] %s2140_s0 }
  0x2b   : > { %v524_v24 = vsel %vm523_vm0, %v2376_v21, 0.0  ;;  %v527_v25 = vsel %vm523_vm0, %v2377_v22, 0.0  ;;  %v530_v29 = vsel %vm523_vm0, %v2380_v26, 0.0  ;;  %v533_v30 = vsel %vm523_vm0, %v2381_v27, 0.0 }
  0x2c   : > { %683 = vadd.xlane.f32.xlu0 %v682_v9  ;;  %689 = vadd.xlane.f32.xlu1 %v688_v10  ;;  %v536_v34 = vsel %vm523_vm0, %v2384_v31, 0.0  ;;  %v539_v35 = vsel %vm523_vm0, %v2385_v32, 0.0  ;;  %v542_v38 = vsel %vm523_vm0, %v2388_v36, 0.0  ;;  %v545_v39 = vsel %vm523_vm0, %v2389_v37, 0.0 }
  0x30   : > { %692 = vadd.xlane.f32.xlu0 %v691_v14  ;;  %695 = vadd.xlane.f32.xlu1 %v694_v15 }
  0x34   : > { %698 = vadd.xlane.f32.xlu0 %v697_v19  ;;  %701 = vadd.xlane.f32.xlu1 %v700_v20 }
  0x38   : > { %525 = vadd.xlane.f32.xlu0 %v524_v24  ;;  %528 = vadd.xlane.f32.xlu1 %v527_v25 }
  0x3c   : > { %531 = vadd.xlane.f32.xlu0 %v530_v29  ;;  %534 = vadd.xlane.f32.xlu1 %v533_v30 }
  0x40   : > { %537 = vadd.xlane.f32.xlu0 %v536_v34  ;;  %540 = vadd.xlane.f32.xlu1 %v539_v35 }
  0x44   : > { %543 = vadd.xlane.f32.xlu0 %v542_v38  ;;  %546 = vadd.xlane.f32.xlu1 %v545_v39 }
  0xb1   : > { %v681_v40 = vpop.xlane.xlu0 %680  ;;  %v687_v41 = vpop.xlane.xlu1 %686 }
  0xb2   : > { %v703_v42 = vmul.f32 0.03125, %v681_v40  ;;  %v705_v43 = vmul.f32 0.03125, %v687_v41 }
  0xb4   : > { %v3113_v44 = vsub.f32 %v2392_v2, %v703_v42  ;;  %v3115_v45 = vsub.f32 %v2396_v3, %v705_v43 }
  0xb5   : > { %v684_v46 = vpop.xlane.xlu0 %683  ;;  %v690_v47 = vpop.xlane.xlu1 %689 }
  0xb6   : > { %v704_v48 = vmul.f32 0.03125, %v684_v46  ;;  %v706_v49 = vmul.f32 0.03125, %v690_v47  ;;  %v719_v50 = vmul.f32 %v3113_v44, %v3113_v44  ;;  %v721_v51 = vmul.f32 %v3115_v45, %v3115_v45 }
  0xb8   : > { %v3123_v52 = vsub.f32 %v2393_v4, %v704_v48  ;;  %v3127_v53 = vsub.f32 %v2397_v5, %v706_v49  ;;  %v727_v54 = vsel %vm523_vm0, %v719_v50, 0.0  ;;  %v733_v57 = vsel %vm523_vm0, %v721_v51, 0.0 }
  0xb9   : > { %v693_v55 = vpop.xlane.xlu0 %692  ;;  %728 = vadd.xlane.f32.xlu0 %v727_v54  ;;  %v696_v56 = vpop.xlane.xlu1 %695 }
  0xba   : > { %v707_v58 = vmul.f32 0.03125, %v693_v55  ;;  %v708_v59 = vmul.f32 0.03125, %v696_v56  ;;  %v720_v60 = vmul.f32 %v3123_v52, %v3123_v52  ;;  %v722_v61 = vmul.f32 %v3127_v53, %v3127_v53  ;;  %v3212_v55 = vld [vmem:[%s3204_s25] sm:$0xff]  }
  0xbc   : > { %v3137_v62 = vsub.f32 %v2400_v11, %v707_v58  ;;  %v3141_v63 = vsub.f32 %v2401_v12, %v708_v59  ;;  %v730_v0 = vsel %vm523_vm0, %v720_v60, 0.0  ;;  %v736_v3 = vsel %vm523_vm0, %v722_v61, 0.0 }
  0xbd   : > { %v699_v1 = vpop.xlane.xlu0 %698  ;;  %731 = vadd.xlane.f32.xlu1 %v730_v0  ;;  %734 = vadd.xlane.f32.xlu0 %v733_v57  ;;  %v702_v2 = vpop.xlane.xlu1 %701  ;;  %v3230_v0 = vld [vmem:[%s3204_s25 + $0x8] sm:$0xff]  }
  0xbe   : > { %v709_v4 = vmul.f32 0.03125, %v699_v1  ;;  %v710_v5 = vmul.f32 0.03125, %v702_v2  ;;  %v723_v7 = vmul.f32 %v3137_v62, %v3137_v62  ;;  %v724_v8 = vmul.f32 %v3141_v63, %v3141_v63 }
  0xbf   : > { %v2409_v2 = vunpack.c.h.bf16 %v3212_v55 }
  0xc0   : > { %v3151_v6 = vsub.f32 %v2404_v16, %v709_v4  ;;  %v3155_v9 = vsub.f32 %v2405_v17, %v710_v5  ;;  %v739_v10 = vsel %vm523_vm0, %v723_v7, 0.0  ;;  %v742_v12 = vsel %vm523_vm0, %v724_v8, 0.0  ;;  %v3240_v4 = vld [vmem:[%s3204_s25 + $0x10] sm:$0xff]  }
  0xc1   : > { %737 = vadd.xlane.f32.xlu1 %v736_v3  ;;  %740 = vadd.xlane.f32.xlu0 %v739_v10  ;;  %v526_v11 = vpop.xlane.xlu0 %525  ;;  %v529_v14 = vpop.xlane.xlu1 %528  ;;  %v2412_v3 = vunpack.c.l.bf16 %v3230_v0  ;;  %v838_v5 = vsel %vm523_vm0, %v2409_v2, 0.0  ;;  %v2413_v8 = vunpack.c.h.bf16 %v3230_v0  ;;  %v2416_v10 = vunpack.c.l.bf16 %v3240_v4 }
  0xc2   : > { %v549_v15 = vmul.f32 0.03125, %v526_v11  ;;  %v550_v19 = vmul.f32 0.03125, %v529_v14  ;;  %v725_v20 = vmul.f32 %v3151_v6, %v3151_v6  ;;  %v726_v16 = vmul.f32 %v3155_v9, %v3155_v9  ;;  %v3251_v11 = vld [vmem:[%s3204_s25 + $0x18] sm:$0xff]  }
  0xc3   : > { %v841_v7 = vsel %vm523_vm0, %v2412_v3, 0.0  ;;  %v844_v14 = vsel %vm523_vm0, %v2413_v8, 0.0 }
  0xc4   : > { %v3165_v13 = vsub.f32 %v2376_v21, %v549_v15  ;;  %v3169_v17 = vsub.f32 %v2377_v22, %v550_v19  ;;  %v745_v24 = vsel %vm523_vm0, %v725_v20, 0.0  ;;  %v748_v29 = vsel %vm523_vm0, %v726_v16, 0.0  ;;  %v2677_v16 = vld [vmem:[%s3724_s6 + $0x10] sm:$0xff]  }
  0xc5   : > { %743 = vadd.xlane.f32.xlu1 %v742_v12  ;;  %746 = vadd.xlane.f32.xlu0 %v745_v24  ;;  %v532_v25 = vpop.xlane.xlu0 %531  ;;  %v535_v30 = vpop.xlane.xlu1 %534  ;;  %v2676_v12 = vld [vmem:[%s3724_s6 + $0x18] sm:$0xff]   ;;  %v847_v15 = vsel %vm523_vm0, %v2416_v10, 0.0  ;;  %v2417_v19 = vunpack.c.h.bf16 %v3240_v4  ;;  %v2420_v20 = vunpack.c.l.bf16 %v3251_v11 }
  0xc6   : > { %v551_v34 = vmul.f32 0.03125, %v532_v25  ;;  %v552_v35 = vmul.f32 0.03125, %v535_v30  ;;  %v565_v38 = vmul.f32 %v3165_v13, %v3165_v13  ;;  %v566_v21 = vmul.f32 %v3169_v17, %v3169_v17  ;;  %2497 = vmatprep.subr.bf16.mxu1 %v2676_v12 }
  0xc7   : > { %2498 = vmatpush3.bf16.msra.mxu1 %v2676_v12  ;;  %v850_v24 = vsel %vm523_vm0, %v2417_v19, 0.0  ;;  %v853_v25 = vsel %vm523_vm0, %v2420_v20, 0.0 }
  0xc8   : > { %v3179_v18 = vsub.f32 %v2380_v26, %v551_v34  ;;  %v3183_v22 = vsub.f32 %v2381_v27, %v552_v35  ;;  %v573_v39 = vsel %vm523_vm0, %v565_v38, 0.0  ;;  %v576_v41 = vsel %vm523_vm0, %v566_v21, 0.0  ;;  %2499 = vmatprep.subr.bf16.mxu1 %v2677_v16  ;;  %v2678_v34 = vld [vmem:[%s3724_s6 + $0x8] sm:$0xff]   ;;  %v2679_v35 = vld [vmem:[%s3724_s6] sm:$0xff]  }
  0xc9   : > { %749 = vadd.xlane.f32.xlu1 %v748_v29  ;;  %574 = vadd.xlane.f32.xlu0 %v573_v39  ;;  %v538_v40 = vpop.xlane.xlu0 %537  ;;  %v541_v42 = vpop.xlane.xlu1 %540  ;;  %v2421_v29 = vunpack.c.h.bf16 %v3251_v11 }
  0xca   : > { %v553_v43 = vmul.f32 0.03125, %v538_v40  ;;  %v554_v46 = vmul.f32 0.03125, %v541_v42  ;;  %v567_v47 = vmul.f32 %v3179_v18, %v3179_v18  ;;  %v568_v26 = vmul.f32 %v3183_v22, %v3183_v22  ;;  %2485 = vmatprep.subr.bf16.mxu0 %v2678_v34 }
  0xcb   : > { %2500 = vmatpush3.bf16.msra.mxu1 %v2677_v16  ;;  %v856_v30 = vsel %vm523_vm0, %v2421_v29, 0.0  ;;  %2486 = vmatpush3.bf16.msra.mxu0 %v2678_v34 }
  0xcc   : > { %v3193_v23 = vsub.f32 %v2384_v31, %v553_v43  ;;  %v3197_v27 = vsub.f32 %v2385_v32, %v554_v46  ;;  %v579_v48 = vsel %vm523_vm0, %v567_v47, 0.0  ;;  %v582_v50 = vsel %vm523_vm0, %v568_v26, 0.0  ;;  %2487 = vmatprep.subr.bf16.mxu0 %v2679_v35 }
  0xcd   : > { %577 = vadd.xlane.f32.xlu1 %v576_v41  ;;  %580 = vadd.xlane.f32.xlu0 %v579_v48  ;;  %v544_v49 = vpop.xlane.xlu0 %543  ;;  %v547_v31 = vpop.xlane.xlu1 %546 }
  0xce   : > { %v555_v51 = vmul.f32 0.03125, %v544_v49  ;;  %v556_v54 = vmul.f32 0.03125, %v547_v31  ;;  %v569_v28 = vmul.f32 %v3193_v23, %v3193_v23  ;;  %v570_v32 = vmul.f32 %v3197_v27, %v3197_v27 }
  0xcf   : > { %2488 = vmatpush3.bf16.msra.mxu0 %v2679_v35 }
  0xd0   : > { %v3216_v56 = vsub.f32 %v2388_v36, %v555_v51  ;;  %v3220_v57 = vsub.f32 %v2389_v37, %v556_v54  ;;  %v585_v58 = vsel %vm523_vm0, %v569_v28, 0.0  ;;  %v588_v59 = vsel %vm523_vm0, %v570_v32, 0.0 }
  0xd1   : > { %583 = vadd.xlane.f32.xlu1 %v582_v50  ;;  %586 = vadd.xlane.f32.xlu0 %v585_v58  ;;  %v2408_v36 = vunpack.c.l.bf16 %v3212_v55 }
  0xd2   : > { %v571_v60 = vmul.f32 %v3216_v56, %v3216_v56  ;;  %v572_v61 = vmul.f32 %v3220_v57, %v3220_v57 }
  0xd3   : > { %v835_v1 = vsel %vm523_vm0, %v2408_v36, 0.0 }
  0xd4   : > { %v591_v33 = vsel %vm523_vm0, %v571_v60, 0.0  ;;  %v594_v37 = vsel %vm523_vm0, %v572_v61, 0.0 }
  0xd5   : > { %589 = vadd.xlane.f32.xlu1 %v588_v59  ;;  %592 = vadd.xlane.f32.xlu0 %v591_v33 }
  0xd9   : > { %595 = vadd.xlane.f32.xlu1 %v594_v37  ;;  %836 = vadd.xlane.f32.xlu0 %v835_v1 }
  0xdd   : > { %839 = vadd.xlane.f32.xlu1 %v838_v5  ;;  %842 = vadd.xlane.f32.xlu0 %v841_v7 }
  0xe1   : > { %845 = vadd.xlane.f32.xlu1 %v844_v14  ;;  %848 = vadd.xlane.f32.xlu0 %v847_v15  ;;  %v3287_v15 = vld [vmem:[%s3744_s4 + $0x1] ss:$0 sm:$0xff] }
  0xe5   : > { %851 = vadd.xlane.f32.xlu1 %v850_v24  ;;  %854 = vadd.xlane.f32.xlu0 %v853_v25 }
  0xe9   : > { %857 = vadd.xlane.f32.xlu1 %v856_v30 }
 0x142   : > { %v729_v38 = vpop.xlane.xlu0 %728 }
 0x143   : > { %v751_v21 = vmul.f32 0.03125, %v729_v38 }
 0x145   : > { %v759_v39 = vadd.f32 1e-05, %v751_v21 }
 0x146   : > { %v732_v40 = vpop.xlane.xlu1 %731  ;;  %v735_v41 = vpop.xlane.xlu0 %734 }
 0x147   : > { %2684 = vrsqrt.f32 %v759_v39  ;;  %v752_v42 = vmul.f32 0.03125, %v732_v40  ;;  %v753_v43 = vmul.f32 0.03125, %v735_v41 }
 0x149   : > { %v760_v46 = vadd.f32 1e-05, %v752_v42  ;;  %v761_v47 = vadd.f32 1e-05, %v753_v43 }
 0x14a   : > { %v738_v26 = vpop.xlane.xlu1 %737  ;;  %v741_v48 = vpop.xlane.xlu0 %740 }
 0x14b   : > { %2686 = vrsqrt.f32 %v760_v46  ;;  %v754_v49 = vmul.f32 0.03125, %v738_v26  ;;  %v755_v50 = vmul.f32 0.03125, %v741_v48 }
 0x14c   : > { %2688 = vrsqrt.f32 %v761_v47 }
 0x14d   : > { %v762_v31 = vadd.f32 1e-05, %v754_v49  ;;  %v763_v51 = vadd.f32 1e-05, %v755_v50 }
 0x14e   : > { %v744_v54 = vpop.xlane.xlu1 %743  ;;  %v747_v28 = vpop.xlane.xlu0 %746 }
 0x14f   : > { %2690 = vrsqrt.f32 %v762_v31  ;;  %v756_v32 = vmul.f32 0.03125, %v744_v54  ;;  %v757_v58 = vmul.f32 0.03125, %v747_v28 }
 0x150   : > { %2692 = vrsqrt.f32 %v763_v51 }
 0x151   : > { %v764_v59 = vadd.f32 1e-05, %v756_v32  ;;  %v765_v60 = vadd.f32 1e-05, %v757_v58 }
 0x152   : > { %v750_v61 = vpop.xlane.xlu1 %749  ;;  %v575_v33 = vpop.xlane.xlu0 %574 }
 0x153   : > { %2694 = vrsqrt.f32 %v764_v59  ;;  %v758_v37 = vmul.f32 0.03125, %v750_v61  ;;  %v597_v1 = vmul.f32 0.03125, %v575_v33 }
 0x154   : > { %v2685_v5 = vpop.eup %2684  ;;  %2696 = vrsqrt.f32 %v765_v60 }
 0x155   : > { %v766_v7 = vadd.f32 1e-05, %v758_v37  ;;  %v605_v12 = vadd.f32 1e-05, %v597_v1  ;;  %v775_v14 = vmul.f32 %v2685_v5, %v3113_v44  ;;  %v3294_v44 = vld [vmem:[%s3723_s5 + $0x1] ss:$0 sm:$0xff] }
 0x156   : > { %v578_v16 = vpop.xlane.xlu1 %577  ;;  %v581_v24 = vpop.xlane.xlu0 %580 }
 0x157   : > { %2698 = vrsqrt.f32 %v766_v7  ;;  %v598_v25 = vmul.f32 0.03125, %v578_v16  ;;  %v599_v30 = vmul.f32 0.03125, %v581_v24  ;;  %v791_v35 = vmul.f32 %v3287_v15, %v775_v14 }
 0x158   : > { %v2687_v34 = vpop.eup %2686  ;;  %2700 = vrsqrt.f32 %v605_v12 }
 0x159   : > { %v2689_v38 = vpop.eup %2688  ;;  %v606_v21 = vadd.f32 1e-05, %v598_v25  ;;  %v607_v39 = vadd.f32 1e-05, %v599_v30  ;;  %v776_v40 = vmul.f32 %v2687_v34, %v3123_v52  ;;  %v807_v49 = vadd.f32 %v3294_v44, %v791_v35 }
 0x15a   : > { %v584_v41 = vpop.xlane.xlu1 %583  ;;  %v587_v42 = vpop.xlane.xlu0 %586  ;;  %v777_v43 = vmul.f32 %v2689_v38, %v3115_v45 }
 0x15b   : > { %2702 = vrsqrt.f32 %v606_v21  ;;  %v600_v46 = vmul.f32 0.03125, %v584_v41  ;;  %v601_v47 = vmul.f32 0.03125, %v587_v42  ;;  %v792_v26 = vmul.f32 %v3287_v15, %v776_v40 }
 0x15c   : > { %v2691_v48 = vpop.eup %2690  ;;  %2704 = vrsqrt.f32 %v607_v39  ;;  %v793_v45 = vmul.f32 %v3287_v15, %v777_v43 }
 0x15d   : > { %v2693_v50 = vpop.eup %2692  ;;  %v608_v52 = vadd.f32 1e-05, %v600_v46  ;;  %v609_v31 = vadd.f32 1e-05, %v601_v47  ;;  %v808_v51 = vadd.f32 %v3294_v44, %v792_v26  ;;  %v778_v54 = vmul.f32 %v2691_v48, %v3127_v53 }
 0x15e   : > { %v590_v28 = vpop.xlane.xlu1 %589  ;;  %v593_v32 = vpop.xlane.xlu0 %592  ;;  %v779_v58 = vmul.f32 %v2693_v50, %v3137_v62  ;;  %v809_v62 = vadd.f32 %v3294_v44, %v793_v45 }
 0x15f   : > { %2706 = vrsqrt.f32 %v608_v52  ;;  %v602_v59 = vmul.f32 0.03125, %v590_v28  ;;  %v603_v60 = vmul.f32 0.03125, %v593_v32  ;;  %v815_v61 = vpack.c.bf16 %v808_v51, %v807_v49  ;;  %v3324_v52 = vld [vmem:[%s3744_s4] ss:$0 sm:$0xff] }
 0x160   : > { %v2695_v33 = vpop.eup %2694  ;;  %2708 = vrsqrt.f32 %v609_v31  ;;  %v794_v37 = vmul.f32 %v3287_v15, %v778_v54  ;;  %v795_v1 = vmul.f32 %v3287_v15, %v779_v58 }
 0x161   : > { %v2697_v5 = vpop.eup %2696  ;;  %v610_v7 = vadd.f32 1e-05, %v602_v59  ;;  %v611_v12 = vadd.f32 1e-05, %v603_v60  ;;  %2501 = vmatprep.mubr.msk.bf16.mxu1 %vm523_vm0, %v815_v61  ;;  %v780_v53 = vmul.f32 %v2695_v33, %v3141_v63 }
 0x162   : > { %v596_v14 = vpop.xlane.xlu1 %595  ;;  %v837_v16 = vpop.xlane.xlu0 %836  ;;  %v810_v24 = vadd.f32 %v3294_v44, %v794_v37  ;;  %v781_v25 = vmul.f32 %v2697_v5, %v3151_v6  ;;  %v811_v39 = vadd.f32 %v3294_v44, %v795_v1 }
 0x163   : > { %2710 = vrsqrt.f32 %v610_v7  ;;  %v604_v30 = vmul.f32 0.03125, %v596_v14  ;;  %v859_v34 = vmul.f32 0.03125, %v837_v16  ;;  %v796_v35 = vmul.f32 %v3287_v15, %v780_v53 }
 0x164   : > { %v2699_v38 = vpop.eup %2698  ;;  %2712 = vrsqrt.f32 %v611_v12  ;;  %v816_v21 = vpack.c.bf16 %v810_v24, %v809_v62  ;;  %v797_v63 = vmul.f32 %v3287_v15, %v781_v25 }
 0x165   : > { %v2701_v40 = vpop.eup %2700  ;;  %v612_v41 = vadd.f32 1e-05, %v604_v30  ;;  %v3315_v42 = vsub.f32 %v2408_v36, %v859_v34  ;;  %v812_v6 = vadd.f32 %v3294_v44, %v796_v35  ;;  %v782_v43 = vmul.f32 %v2699_v38, %v3155_v9 }
 0x166   : > { %2502 = vmatmul.mubr.msk.bf16.vlgmr.msra.gmra.mxu1 %vm523_vm0, %v816_v21  ;;  %v840_v46 = vpop.xlane.xlu1 %839  ;;  %v843_v47 = vpop.xlane.xlu0 %842  ;;  %v621_v26 = vmul.f32 %v2701_v40, %v3165_v13  ;;  %v813_v28 = vadd.f32 %v3294_v44, %v797_v63 }
 0x167   : > { %2714 = vrsqrt.f32 %v612_v41  ;;  %v860_v48 = vmul.f32 0.03125, %v840_v46  ;;  %v861_v49 = vmul.f32 0.03125, %v843_v47  ;;  %v817_v50 = vpack.c.bf16 %v812_v6, %v811_v39 }
 0x168   : > { %v2703_v36 = vpop.eup %2702  ;;  %v875_v31 = vmul.f32 %v3315_v42, %v3315_v42  ;;  %v798_v9 = vmul.f32 %v3287_v15, %v782_v43  ;;  %v636_v55 = vmul.f32 %v3324_v52, %v621_v26 }
 0x169   : > { %v2705_v51 = vpop.eup %2704  ;;  %v3331_v54 = vsub.f32 %v2409_v2, %v860_v48  ;;  %v3335_v13 = vsub.f32 %v2412_v3, %v861_v49  ;;  %2505 = vmatprep.mubr.msk.bf16.mxu1 %vm523_vm0, %v817_v50  ;;  %v622_v32 = vmul.f32 %v2703_v36, %v3169_v17  ;;  %v2307_v17 = vld [vmem:[%s3723_s5] ss:$0 sm:$0xff] }
 0x16a   : > { %v846_v45 = vpop.xlane.xlu1 %845  ;;  %v883_v58 = vsel %vm523_vm0, %v875_v31, 0.0  ;;  %v849_v59 = vpop.xlane.xlu0 %848  ;;  %v814_v15 = vadd.f32 %v3294_v44, %v798_v9  ;;  %v623_v2 = vmul.f32 %v2705_v51, %v3179_v18  ;;  %v651_v24 = vadd.f32 %v2307_v17, %v636_v55  ;;  %v2680_v55 = vld [vmem:[%s3724_s6 + $0x28] sm:$0xff]  }
 0x16b   : > { %v862_v60 = vmul.f32 0.03125, %v846_v45  ;;  %884 = vadd.xlane.f32.xlu0 %v883_v58  ;;  %v863_v3 = vmul.f32 0.03125, %v849_v59  ;;  %v876_v61 = vmul.f32 %v3331_v54, %v3331_v54  ;;  %v877_v33 = vmul.f32 %v3335_v13, %v3335_v13  ;;  %2509 = vmatprep.subr.bf16.mxu0 %v2680_v55 }
 0x16c   : > { %v2707_v37 = vpop.eup %2706  ;;  %v818_v1 = vpack.c.bf16 %v814_v15, %v813_v28  ;;  %v637_v44 = vmul.f32 %v3324_v52, %v622_v32  ;;  %v638_v5 = vmul.f32 %v3324_v52, %v623_v2  ;;  %v2681_v2 = vld [vmem:[%s3724_s6 + $0x20] sm:$0xff]  }
 0x16d   : > { %v2709_v18 = vpop.eup %2708  ;;  %v3355_v7 = vsub.f32 %v2413_v8, %v862_v60  ;;  %v3359_v12 = vsub.f32 %v2416_v10, %v863_v3  ;;  %v886_v53 = vsel %vm523_vm0, %v876_v61, 0.0  ;;  %v889_v14 = vsel %vm523_vm0, %v877_v33, 0.0 }
 0x16e   : > { %2506 = vmatmul.mubr.msk.bf16.gmra.mxu1 %vm523_vm0, %v818_v1  ;;  %887 = vadd.xlane.f32.xlu1 %v886_v53  ;;  %v852_v16 = vpop.xlane.xlu1 %851  ;;  %v855_v62 = vpop.xlane.xlu0 %854  ;;  %v652_v25 = vadd.f32 %v2307_v17, %v637_v44  ;;  %v624_v30 = vmul.f32 %v2707_v37, %v3183_v22  ;;  %v653_v39 = vadd.f32 %v2307_v17, %v638_v5 }
 0x16f   : > { %v864_v0 = vmul.f32 0.03125, %v852_v16  ;;  %890 = vadd.xlane.f32.xlu0 %v889_v14  ;;  %v865_v8 = vmul.f32 0.03125, %v855_v62  ;;  %v878_v10 = vmul.f32 %v3355_v7, %v3355_v7  ;;  %v879_v34 = vmul.f32 %v3359_v12, %v3359_v12 }
 0x170   : > { %v2711_v35 = vpop.eup %2710  ;;  %v659_v38 = vpack.c.bf16 %v652_v25, %v651_v24  ;;  %v639_v21 = vmul.f32 %v3324_v52, %v624_v30  ;;  %v625_v63 = vmul.f32 %v2709_v18, %v3193_v23 }
 0x171   : > { %v2713_v40 = vpop.eup %2712  ;;  %v3373_v22 = vsub.f32 %v2417_v19, %v864_v0  ;;  %v3377_v41 = vsub.f32 %v2420_v20, %v865_v8  ;;  %v892_v6 = vsel %vm523_vm0, %v878_v10, 0.0  ;;  %v895_v43 = vsel %vm523_vm0, %v879_v34, 0.0 }
 0x172   : > { %2489 = vmatprep.mubr.msk.bf16.mxu0 %vm523_vm0, %v659_v38  ;;  %893 = vadd.xlane.f32.xlu1 %v892_v6  ;;  %v858_v46 = vpop.xlane.xlu1 %857  ;;  %v654_v47 = vadd.f32 %v2307_v17, %v639_v21  ;;  %v626_v23 = vmul.f32 %v2711_v35, %v3197_v27  ;;  %v640_v26 = vmul.f32 %v3324_v52, %v625_v63 }
 0x173   : > { %v866_v4 = vmul.f32 0.03125, %v858_v46  ;;  %896 = vadd.xlane.f32.xlu0 %v895_v43  ;;  %v880_v19 = vmul.f32 %v3373_v22, %v3373_v22  ;;  %v881_v20 = vmul.f32 %v3377_v41, %v3377_v41  ;;  %v627_v48 = vmul.f32 %v2713_v40, %v3216_v56 }
 0x174   : > { %v2715_v49 = vpop.eup %2714  ;;  %v660_v50 = vpack.c.bf16 %v654_v47, %v653_v39  ;;  %v641_v36 = vmul.f32 %v3324_v52, %v626_v23  ;;  %v655_v28 = vadd.f32 %v2307_v17, %v640_v26  ;;  %v2313_v39 = vld [vmem:[%s3744_s4 + $0x2] ss:$0 sm:$0xff]  ;;  %s2370_s4 = sshll.u32 %s2876_s17, 3 }
 0x175   : > { %v3392_v31 = vsub.f32 %v2421_v29, %v866_v4  ;;  %v898_v27 = vsel %vm523_vm0, %v880_v19, 0.0  ;;  %v901_v9 = vsel %vm523_vm0, %v881_v20, 0.0  ;;  %v628_v51 = vmul.f32 %v2715_v49, %v3220_v57  ;;  %v2315_v23 = vld [vmem:[%s3723_s5 + $0x2] ss:$0 sm:$0xff]  ;;  %s2137_s16 = sadd.s32 %s2370_s4, %s2303_s19  ;;  %s2796_s19 = scalar_lea.vmem %s3661_s0, 512 }
 0x176   : > { %2490 = vmatmul.mubr.msk.bf16.vlgmr.msra.gmra.mxu0 %vm523_vm0, %v660_v50  ;;  %899 = vadd.xlane.f32.xlu1 %v898_v27  ;;  %v656_v32 = vadd.f32 %v2307_v17, %v641_v36  ;;  %v642_v56 = vmul.f32 %v3324_v52, %v627_v48  ;;  %p2797_p1 = scmp.ne.s32.totalorder %s3661_s0, %s2796_s19 }
 0x177   : > { %902 = vadd.xlane.f32.xlu0 %v901_v9  ;;  %v882_v45 = vmul.f32 %v3392_v31, %v3392_v31  ;;  %v643_v11 = vmul.f32 %v3324_v52, %v628_v51  ;;  %2510 = vmatpush3.bf16.msra.mxu0 %v2680_v55 }
 0x178   : > { %v661_v29 = vpack.c.bf16 %v656_v32, %v655_v28  ;;  %v657_v59 = vadd.f32 %v2307_v17, %v642_v56  ;;  %2511 = vmatprep.subr.bf16.mxu0 %v2681_v2  ;;  %p2798_p2 = pnand %p2797_p1, %p3001_p3 }
 0x179   : > { %v904_v58 = vsel %vm523_vm0, %v882_v45, 0.0  ;;  %v658_v15 = vadd.f32 %v2307_v17, %v643_v11 }
 0x17a   : > { %2493 = vmatprep.mubr.msk.bf16.mxu0 %vm523_vm0, %v661_v29  ;;  %905 = vadd.xlane.f32.xlu1 %v904_v58  ;;  %p2799_p4 = pneg %p2798_p2 }
 0x17b   : > { %v662_v57 = vpack.c.bf16 %v658_v15, %v657_v59  ;;  %2512 = vmatpush3.bf16.msra.mxu0 %v2681_v2 }
 0x17e   : > { %2494 = vmatmul.mubr.msk.bf16.gmra.mxu0 %vm523_vm0, %v662_v57 }
 0x1f4   : > { %v885_v52 = vpop.xlane.xlu0 %884 }
 0x1f5   : > { %v907_v60 = vmul.f32 0.03125, %v885_v52  ;;  %v2328_v52 = vld [vmem:[%s3725_s7 + $0x1] ss:$0 sm:$0xff] }
 0x1f7   : > { %v915_v3 = vadd.f32 1e-05, %v907_v60  ;;  %v888_v61 = vpop.xlane.xlu1 %887 }
 0x1f8   : > { %v908_v33 = vmul.f32 0.03125, %v888_v61  ;;  %v891_v17 = vpop.xlane.xlu0 %890 }
 0x1f9   : > { %2716 = vrsqrt.f32 %v915_v3  ;;  %v909_v37 = vmul.f32 0.03125, %v891_v17 }
 0x1fa   : > { %v916_v1 = vadd.f32 1e-05, %v908_v33 }
 0x1fb   : > { %v917_v44 = vadd.f32 1e-05, %v909_v37  ;;  %v894_v5 = vpop.xlane.xlu1 %893 }
 0x1fc   : > { %2718 = vrsqrt.f32 %v916_v1  ;;  %v910_v18 = vmul.f32 0.03125, %v894_v5  ;;  %v897_v53 = vpop.xlane.xlu0 %896 }
 0x1fd   : > { %2720 = vrsqrt.f32 %v917_v44  ;;  %v911_v14 = vmul.f32 0.03125, %v897_v53 }
 0x1fe   : > { %v918_v16 = vadd.f32 1e-05, %v910_v18 }
 0x1ff   : > { %v919_v62 = vadd.f32 1e-05, %v911_v14  ;;  %v900_v24 = vpop.xlane.xlu1 %899 }
 0x200   : > { %2722 = vrsqrt.f32 %v918_v16  ;;  %v912_v25 = vmul.f32 0.03125, %v900_v24  ;;  %v903_v30 = vpop.xlane.xlu0 %902 }
 0x201   : > { %2724 = vrsqrt.f32 %v919_v62  ;;  %v913_v0 = vmul.f32 0.03125, %v903_v30 }
 0x202   : > { %v920_v8 = vadd.f32 1e-05, %v912_v25 }
 0x203   : > { %v921_v10 = vadd.f32 1e-05, %v913_v0  ;;  %v906_v34 = vpop.xlane.xlu1 %905 }
 0x204   : > { %2726 = vrsqrt.f32 %v920_v8  ;;  %v914_v35 = vmul.f32 0.03125, %v906_v34 }
 0x205   : > { %2728 = vrsqrt.f32 %v921_v10 }
 0x206   : > { %v2717_v38 = vpop.eup %2716  ;;  %v922_v21 = vadd.f32 1e-05, %v914_v35 }
 0x207   : > { %v931_v63 = vmul.f32 %v2717_v38, %v3315_v42 }
 0x208   : > { %2730 = vrsqrt.f32 %v922_v21 }
 0x209   : > { %v2719_v40 = vpop.eup %2718  ;;  %v947_v46 = vmul.f32 %v2313_v39, %v931_v63 }
 0x20a   : > { %v2721_v6 = vpop.eup %2720  ;;  %v932_v43 = vmul.f32 %v2719_v40, %v3331_v54 }
 0x20b   : > { %v933_v47 = vmul.f32 %v2721_v6, %v3335_v13  ;;  %v963_v49 = vadd.f32 %v2315_v23, %v947_v46 }
 0x20c   : > { %v948_v26 = vmul.f32 %v2313_v39, %v932_v43 }
 0x20d   : > { %v2723_v4 = vpop.eup %2722  ;;  %v949_v20 = vmul.f32 %v2313_v39, %v933_v47 }
 0x20e   : > { %v2725_v19 = vpop.eup %2724  ;;  %v934_v48 = vmul.f32 %v2723_v4, %v3355_v7  ;;  %v964_v42 = vadd.f32 %v2315_v23, %v948_v26 }
 0x20f   : > { %v935_v50 = vmul.f32 %v2725_v19, %v3359_v12  ;;  %v965_v13 = vadd.f32 %v2315_v23, %v949_v20 }
 0x210   : > { %v950_v36 = vmul.f32 %v2313_v39, %v934_v48  ;;  %v971_v27 = vpack.c.bf16 %v964_v42, %v963_v49 }
 0x211   : > { %v2727_v54 = vpop.eup %2726  ;;  %v951_v32 = vmul.f32 %v2313_v39, %v935_v50 }
 0x212   : > { %v2729_v9 = vpop.eup %2728  ;;  %2513 = vmatprep.mubr.msk.bf16.mxu0 %vm523_vm0, %v971_v27  ;;  %v966_v51 = vadd.f32 %v2315_v23, %v950_v36  ;;  %v936_v28 = vmul.f32 %v2727_v54, %v3373_v22 }
 0x213   : > { %v937_v56 = vmul.f32 %v2729_v9, %v3377_v41  ;;  %v967_v29 = vadd.f32 %v2315_v23, %v951_v32 }
 0x214   : > { %v972_v45 = vpack.c.bf16 %v966_v51, %v965_v13  ;;  %v952_v11 = vmul.f32 %v2313_v39, %v936_v28  ;;  %v2340_v13 = vld [vmem:[%s3725_s7 + $0x2] ss:$0 sm:$0xff] }
 0x215   : > { %v2731_v7 = vpop.eup %2730  ;;  %v953_v59 = vmul.f32 %v2313_v39, %v937_v56 }
 0x216   : > { %2514 = vmatmul.mubr.msk.bf16.vlgmr.msra.gmra.mxu0 %vm523_vm0, %v972_v45  ;;  %v968_v12 = vadd.f32 %v2315_v23, %v952_v11  ;;  %v938_v58 = vmul.f32 %v2731_v7, %v3392_v31 }
 0x217   : > { %v969_v55 = vadd.f32 %v2315_v23, %v953_v59 }
 0x218   : > { %v973_v15 = vpack.c.bf16 %v968_v12, %v967_v29  ;;  %v954_v57 = vmul.f32 %v2313_v39, %v938_v58  ;;  %v2316_v39 = vld [vmem:[%s3725_s7] ss:$0 sm:$0xff] }
 0x21a   : > { %2517 = vmatprep.mubr.msk.bf16.mxu0 %vm523_vm0, %v973_v15  ;;  %v970_v2 = vadd.f32 %v2315_v23, %v954_v57 }
 0x21c   : > { %v974_v22 = vpack.c.bf16 %v970_v2, %v969_v55 }
 0x21e   : > { %2518 = vmatmul.mubr.msk.bf16.gmra.mxu0 %vm523_vm0, %v974_v22 }
 0x226   : > { %v2503_v41 = vpop.f32.mrf.mxu1 }
 0x227   : > { %v1159_v61 = vadd.f32 %v2503_v41, %v2328_v52 }
 0x228   : > { %v1150_v60 = vpop.f32.mrf.mxu1 }
 0x229   : > { %v1151_v17 = vadd.f32 %v2328_v52, %v1150_v60 }
 0x22a   : > { %v2504_v3 = vpop.f32.mrf.mxu1 }
 0x22b   : > { %v1162_v33 = vadd.f32 %v2504_v3, %v2328_v52 }
 0x22c   : > { %v1153_v31 = vpop.f32.mrf.mxu1 }
 0x22d   : > { %v3432_v37 = vpack.c.bf16 %v1162_v33, %v1159_v61  ;;  %v1154_v1 = vadd.f32 %v2328_v52, %v1153_v31 }
 0x22e   : > { %v2507_v44 = vpop.f32.mrf.mxu1 }
 0x22f   : > { %v3434_v5 = vpack.c.bf16 %v1154_v1, %v1151_v17  ;;  %2593 = vmatprep.subr.msk.bf16.mxu1 %vm1291_vm1, %v3432_v37  ;;  %v1302_v18 = vsel %vm1291_vm1, %v3432_v37, 0  ;;  %v1175_v16 = vadd.f32 %v2507_v44, %v2328_v52 }
 0x230   : > { %v1166_v53 = vpop.f32.mrf.mxu1  ;;  %2522 = vmatpush3.bf16.xpose.msra.mxu1 %v1302_v18 }
 0x231   : > { %2594 = vmatprep.subr.msk.bf16.mxu1 %vm1291_vm1, %v3434_v5  ;;  %v1167_v25 = vadd.f32 %v2328_v52, %v1166_v53  ;;  %v1299_v34 = vsel %vm1291_vm1, %v3434_v5, 0 }
 0x232   : > { %v2508_v14 = vpop.f32.mrf.mxu1 }
 0x233   : > { %v1178_v62 = vadd.f32 %v2508_v14, %v2328_v52 }
 0x234   : > { %v1169_v24 = vpop.f32.mrf.mxu1 }
 0x235   : > { %v3442_v30 = vpack.c.bf16 %v1178_v62, %v1175_v16  ;;  %v1170_v0 = vadd.f32 %v2328_v52, %v1169_v24 }
 0x236   : > { %v2491_v8 = vpop.f32.mrf.mxu0 }
 0x237   : > { %v3444_v10 = vpack.c.bf16 %v1170_v0, %v1167_v25  ;;  %2595 = vmatprep.subr.msk.bf16.mxu0 %vm1291_vm1, %v3442_v30  ;;  %v1363_v35 = vsel %vm1291_vm1, %v3442_v30, 0  ;;  %v1053_v46 = vadd.f32 %v2491_v8, %v2316_v39 }
 0x238   : > { %v1044_v38 = vpop.f32.mrf.mxu0  ;;  %2524 = vmatpush3.bf16.xpose.msra.mxu1 %v1299_v34  ;;  %2530 = vmatpush3.bf16.xpose.msra.mxu0 %v1363_v35 }
 0x239   : > { %2596 = vmatprep.subr.msk.bf16.mxu0 %vm1291_vm1, %v3444_v10  ;;  %v1045_v6 = vadd.f32 %v2316_v39, %v1044_v38  ;;  %v1360_v26 = vsel %vm1291_vm1, %v3444_v10, 0 }
 0x23a   : > { %v2492_v21 = vpop.f32.mrf.mxu0 }
 0x23b   : > { %v1056_v63 = vadd.f32 %v2492_v21, %v2316_v39 }
 0x23c   : > { %v1047_v40 = vpop.f32.mrf.mxu0 }
 0x23d   : > { %v1048_v43 = vadd.f32 %v2316_v39, %v1047_v40  ;;  %v3461_v4 = vpack.c.bf16 %v1056_v63, %v1053_v46 }
 0x23e   : > { %v2495_v47 = vpop.f32.mrf.mxu0 }
 0x23f   : > { %v3457_v23 = vpack.c.bf16 %v1048_v43, %v1045_v6  ;;  %v1069_v36 = vadd.f32 %v2495_v47, %v2316_v39 }
 0x240   : > { %v1060_v19 = vpop.f32.mrf.mxu0  ;;  %2532 = vmatpush3.bf16.xpose.msra.mxu0 %v1360_v26 }
 0x241   : > { %2525 = vmatprep.mubr.msk.bf16.mxu1 %vm1291_vm1, %v3457_v23  ;;  %v1061_v42 = vadd.f32 %v2316_v39, %v1060_v19 }
 0x242   : > { %v2496_v20 = vpop.f32.mrf.mxu0  ;;  %2526 = vmatmul.mubr.msk.bf16.vlgmr.msra.gmra.mxu1 %vm1291_vm1, %v3461_v4 }
 0x243   : > { %v1072_v48 = vadd.f32 %v2496_v20, %v2316_v39 }
 0x244   : > { %v1063_v49 = vpop.f32.mrf.mxu0 }
 0x245   : > { %v1064_v50 = vadd.f32 %v2316_v39, %v1063_v49  ;;  %v3469_v54 = vpack.c.bf16 %v1072_v48, %v1069_v36 }
 0x247   : > { %v3467_v27 = vpack.c.bf16 %v1064_v50, %v1061_v42 }
 0x249   : > { %2533 = vmatprep.mubr.msk.bf16.mxu0 %vm1291_vm1, %v3467_v27 }
 0x24a   : > { %2534 = vmatmul.mubr.msk.bf16.vlgmr.msra.gmra.mxu0 %vm1291_vm1, %v3469_v54 }
 0x2d6   : > { %v2515_v9 = vpop.f32.mrf.mxu0 }
 0x2d7   : > { %v1265_v32 = vadd.f32 %v2515_v9, %v2340_v13 }
 0x2d8   : > { %v1256_v51 = vpop.f32.mrf.mxu0 }
 0x2d9   : > { %v1257_v11 = vadd.f32 %v2340_v13, %v1256_v51 }
 0x2da   : > { %v2516_v28 = vpop.f32.mrf.mxu0 }
 0x2db   : > { %v1268_v56 = vadd.f32 %v2516_v28, %v2340_v13 }
 0x2dc   : > { %v1259_v45 = vpop.f32.mrf.mxu0 }
 0x2dd   : > { %v3478_v7 = vpack.c.bf16 %v1268_v56, %v1265_v32  ;;  %v1260_v29 = vadd.f32 %v2340_v13, %v1259_v45 }
 0x2de   : > { %v2519_v12 = vpop.f32.mrf.mxu0 }
 0x2df   : > { %v3480_v58 = vpack.c.bf16 %v1260_v29, %v1257_v11  ;;  %2537 = vmatprep.subr.bf16.mxu1 %v3478_v7  ;;  %v1281_v55 = vadd.f32 %v2519_v12, %v2340_v13 }
 0x2e0   : > { %v1272_v59 = vpop.f32.mrf.mxu0  ;;  %2538 = vmatpush3.bf16.msra.mxu1 %v3478_v7 }
 0x2e1   : > { %v1273_v15 = vadd.f32 %v2340_v13, %v1272_v59  ;;  %2539 = vmatprep.subr.bf16.mxu1 %v3480_v58 }
 0x2e2   : > { %v2520_v57 = vpop.f32.mrf.mxu0 }
 0x2e3   : > { %v1284_v2 = vadd.f32 %v2520_v57, %v2340_v13 }
 0x2e4   : > { %v1275_v22 = vpop.f32.mrf.mxu0  ;;  %2540 = vmatpush3.bf16.msra.mxu1 %v3480_v58 }
 0x2e5   : > { %v3486_v41 = vpack.c.bf16 %v1284_v2, %v1281_v55  ;;  %v1276_v52 = vadd.f32 %v2340_v13, %v1275_v22 }
 0x2e7   : > { %v3488_v60 = vpack.c.bf16 %v1276_v52, %v1273_v15  ;;  %2545 = vmatprep.subr.bf16.mxu1 %v3486_v41 }
 0x302   : > { %v2527_v3 = vpop.f32.mrf.mxu1 }
 0x303   : > { %v1420_v44 = vsel %vm523_vm0, %v2527_v3, -inf }
 0x304   : > { %v1338_v61 = vpop.f32.mrf.mxu1 }
 0x305   : > { %v1414_v33 = vsel %vm523_vm0, %v1338_v61, -inf }
 0x306   : > { %v2528_v31 = vpop.f32.mrf.mxu1  ;;  %1415 = vmax.xlane.f32.xlu0 %v1414_v33 }
 0x307   : > { %v1423_v14 = vsel %vm523_vm0, %v2528_v31, -inf }
 0x308   : > { %v1341_v17 = vpop.f32.mrf.mxu1 }
 0x309   : > { %v1417_v1 = vsel %vm523_vm0, %v1341_v17, -inf }
 0x30a   : > { %1418 = vmax.xlane.f32.xlu1 %v1417_v1  ;;  %1421 = vmax.xlane.f32.xlu0 %v1420_v44  ;;  %v2535_v18 = vpop.f32.mrf.mxu0 }
 0x30b   : > { %v1432_v25 = vsel %vm523_vm0, %v2535_v18, -inf }
 0x30c   : > { %v1399_v53 = vpop.f32.mrf.mxu0 }
 0x30d   : > { %v1426_v16 = vsel %vm523_vm0, %v1399_v53, -inf }
 0x30e   : > { %1424 = vmax.xlane.f32.xlu1 %v1423_v14  ;;  %1427 = vmax.xlane.f32.xlu0 %v1426_v16  ;;  %v2536_v62 = vpop.f32.mrf.mxu0 }
 0x30f   : > { %v1435_v8 = vsel %vm523_vm0, %v2536_v62, -inf }
 0x310   : > { %v1402_v24 = vpop.f32.mrf.mxu0 }
 0x311   : > { %v1429_v0 = vsel %vm523_vm0, %v1402_v24, -inf }
 0x312   : > { %1433 = vmax.xlane.f32.xlu0 %v1432_v25  ;;  %1430 = vmax.xlane.f32.xlu1 %v1429_v0 }
 0x316   : > { %1436 = vmax.xlane.f32.xlu1 %v1435_v8 }
 0x38f   : > { %v1416_v34 = vpop.xlane.xlu0 %1415 }
 0x390   : > { %v1438_v35 = vsub.f32 %v1338_v61, %v1416_v34 }
 0x392   : > { %v1446_v6 = vmul.f32 1.442695, %v1438_v35 }
 0x393   : > { %v1419_v38 = vpop.xlane.xlu1 %1418  ;;  %v1422_v21 = vpop.xlane.xlu0 %1421 }
 0x394   : > { %v1440_v39 = vsub.f32 %v2527_v3, %v1422_v21  ;;  %v1439_v63 = vsub.f32 %v1341_v17, %v1419_v38 }
 0x396   : > { %v1450_v40 = vmul.f32 1.442695, %v1440_v39  ;;  %v1448_v26 = vmul.f32 1.442695, %v1439_v63 }
 0x397   : > { %v1425_v43 = vpop.xlane.xlu1 %1424  ;;  %v1428_v46 = vpop.xlane.xlu0 %1427 }
 0x398   : > { %v1441_v47 = vsub.f32 %v2528_v31, %v1425_v43  ;;  %2732 = vpow2.f32 %v1450_v40  ;;  %v1442_v20 = vsub.f32 %v1399_v53, %v1428_v46 }
 0x399   : > { %2734 = vpow2.f32 %v1446_v6 }
 0x39a   : > { %v1452_v19 = vmul.f32 1.442695, %v1441_v47  ;;  %v1454_v50 = vmul.f32 1.442695, %v1442_v20 }
 0x39b   : > { %v1434_v48 = vpop.xlane.xlu0 %1433  ;;  %v1431_v15 = vpop.xlane.xlu1 %1430 }
 0x39c   : > { %2736 = vpow2.f32 %v1452_v19  ;;  %v1444_v49 = vsub.f32 %v2535_v18, %v1434_v48  ;;  %v1443_v2 = vsub.f32 %v1402_v24, %v1431_v15 }
 0x39d   : > { %2738 = vpow2.f32 %v1448_v26 }
 0x39e   : > { %v1458_v42 = vmul.f32 1.442695, %v1444_v49  ;;  %v1456_v52 = vmul.f32 1.442695, %v1443_v2 }
 0x39f   : > { %v1437_v57 = vpop.xlane.xlu1 %1436 }
 0x3a0   : > { %2740 = vpow2.f32 %v1458_v42  ;;  %v1445_v55 = vsub.f32 %v2536_v62, %v1437_v57 }
 0x3a1   : > { %2742 = vpow2.f32 %v1454_v50 }
 0x3a2   : > { %v1460_v22 = vmul.f32 1.442695, %v1445_v55 }
 0x3a4   : > { %2744 = vpow2.f32 %v1460_v22 }
 0x3a5   : > { %v3499_v36 = vpop.eup %2732  ;;  %2746 = vpow2.f32 %v1456_v52 }
 0x3a6   : > { %v1468_v9 = vsel %vm523_vm0, %v3499_v36, 0.0  ;;  %v2735_v13 = vpop.eup %2734 }
 0x3a7   : > { %1469 = vadd.xlane.f32.xlu0 %v1468_v9  ;;  %v1462_v56 = vsel %vm523_vm0, %v2735_v13, 0.0 }
 0x3a9   : > { %v2737_v51 = vpop.eup %2736 }
 0x3aa   : > { %v1471_v28 = vsel %vm523_vm0, %v2737_v51, 0.0  ;;  %v2739_v32 = vpop.eup %2738 }
 0x3ab   : > { %1472 = vadd.xlane.f32.xlu1 %v1471_v28  ;;  %1463 = vadd.xlane.f32.xlu0 %v1462_v56  ;;  %v1465_v11 = vsel %vm523_vm0, %v2739_v32, 0.0 }
 0x3ad   : > { %v3505_v45 = vpop.eup %2740 }
 0x3ae   : > { %v1480_v29 = vsel %vm523_vm0, %v3505_v45, 0.0  ;;  %v3510_v12 = vpop.eup %2742 }
 0x3af   : > { %1466 = vadd.xlane.f32.xlu1 %v1465_v11  ;;  %1481 = vadd.xlane.f32.xlu0 %v1480_v29  ;;  %v1474_v59 = vsel %vm523_vm0, %v3510_v12, 0.0 }
 0x3b1   : > { %v2745_v3 = vpop.eup %2744 }
 0x3b2   : > { %v2747_v61 = vpop.eup %2746 }
 0x3b3   : > { %1475 = vadd.xlane.f32.xlu0 %v1474_v59  ;;  %v1477_v33 = vsel %vm523_vm0, %v2747_v61, 0.0 }
 0x3c0   : > { %1699 = vrot.lane.b32.xlu1 %v3442_v30, %s2890_s23  ;;  %v1483_v30 = vsel %vm523_vm0, %v2745_v3, 0.0 }
 0x3c9   : > { %1626 = vrot.lane.b32.xlu0 %v3432_v37, %s2890_s23 }
 0x3cd   : > { %1618 = vrot.lane.b32.xlu0 %v3457_v23, %s2890_s23 }
 0x3d1   : > { %1691 = vrot.lane.b32.xlu0 %v3467_v27, %s2890_s23 }
 0x3e4   : > { %1484 = vadd.xlane.f32.xlu1 %v1483_v30 }
 0x3e8   : > { %1478 = vadd.xlane.f32.xlu1 %v1477_v33 }
 0x3f9   : > { %1624 = vrot.lane.b32.xlu1 %v3434_v5, %s2890_s23 }
 0x3fd   : > { %1697 = vrot.lane.b32.xlu1 %v3444_v10, %s2890_s23 }
 0x401   : > { %1620 = vrot.lane.b32.xlu1 %v3461_v4, %s2890_s23 }
 0x405   : > { %1693 = vrot.lane.b32.xlu1 %v3469_v54, %s2890_s23 }
 0x430   : > { %v1470_v37 = vpop.xlane.xlu0 %1469 }
 0x434   : > { %v1473_v23 = vpop.xlane.xlu1 %1472  ;;  %v1464_v27 = vpop.xlane.xlu0 %1463 }
 0x435   : > { %2748 = vrcp.f32 %v1473_v23 }
 0x436   : > { %2750 = vrcp.f32 %v1464_v27 }
 0x437   : > { %2752 = vrcp.f32 %v1470_v37 }
 0x438   : > { %v1467_v31 = vpop.xlane.xlu1 %1466  ;;  %v1482_v17 = vpop.xlane.xlu0 %1481 }
 0x439   : > { %2754 = vrcp.f32 %v1467_v31 }
 0x43c   : > { %v1476_v1 = vpop.xlane.xlu0 %1475  ;;  %v1700_v8 = vpop.permute.xlu1 %1699 }
 0x43d   : > { %v1711_v42 = vsel %vm1291_vm1, %v1700_v8, 0 }
 0x440   : > { %v1627_v5 = vpop.permute.xlu0 %1626 }
 0x441   : > { %v1638_v44 = vsel %vm1291_vm1, %v1627_v5, 0  ;;  %2597 = vmatprep.subr.msk.bf16.mxu0 %vm1291_vm1, %v1627_v5 }
 0x442   : > { %v2749_v10 = vpop.eup %2748  ;;  %2554 = vmatpush3.bf16.xpose.msra.mxu0 %v1638_v44 }
 0x443   : > { %v2751_v4 = vpop.eup %2750  ;;  %v1497_v14 = vmul.f32 %v2749_v10, %v2737_v51 }
 0x444   : > { %v2753_v18 = vpop.eup %2752  ;;  %v1619_v54 = vpop.permute.xlu0 %1618  ;;  %v1494_v16 = vmul.f32 %v2751_v4, %v2735_v13 }
 0x445   : > { %2557 = vmatprep.mubr.msk.bf16.mxu0 %vm1291_vm1, %v1619_v54  ;;  %v1496_v24 = vmul.f32 %v2753_v18, %v3499_v36 }
 0x446   : > { %v2755_v53 = vpop.eup %2754 }
 0x447   : > { %v1495_v62 = vmul.f32 %v2755_v53, %v2739_v32  ;;  %v1503_v0 = vpack.c.bf16 %v1497_v14, %v1496_v24 }
 0x448   : > { %v1692_v50 = vpop.permute.xlu0 %1691 }
 0x449   : > { %v1502_v25 = vpack.c.bf16 %v1495_v62, %v1494_v16 }
 0x44b   : > { %2541 = vmatprep.mubr.msk.bf16.mxu1 %vm523_vm0, %v1502_v25 }
 0x44c   : > { %2542 = vmatmul.mubr.msk.bf16.vlgmr.msra.gmra.mxu1 %vm523_vm0, %v1503_v0 }
 0x44d   : > { %2546 = vmatpush3.bf16.msra.mxu1 %v3486_v41 }
 0x44e   : > { %2547 = vmatprep.subr.bf16.mxu1 %v3488_v60 }
 0x451   : > { %2548 = vmatpush3.bf16.msra.mxu1 %v3488_v60 }
 0x452   : > { %2599 = vmatprep.subr.msk.bf16.mxu1 %vm1291_vm1, %v1700_v8 }
 0x46d   : > { %v1485_v34 = vpop.xlane.xlu1 %1484 }
 0x46e   : > { %2756 = vrcp.f32 %v1485_v34 }
 0x46f   : > { %2758 = vrcp.f32 %v1476_v1 }
 0x470   : > { %2760 = vrcp.f32 %v1482_v17 }
 0x471   : > { %v1479_v35 = vpop.xlane.xlu1 %1478 }
 0x472   : > { %2762 = vrcp.f32 %v1479_v35 }
 0x475   : > { %v1625_v38 = vpop.permute.xlu1 %1624 }
 0x476   : > { %v1635_v21 = vsel %vm1291_vm1, %v1625_v38, 0  ;;  %2598 = vmatprep.subr.msk.bf16.mxu0 %vm1291_vm1, %v1625_v38 }
 0x477   : > { %2556 = vmatpush3.bf16.xpose.msra.mxu0 %v1635_v21 }
 0x479   : > { %v1698_v39 = vpop.permute.xlu1 %1697 }
 0x47a   : > { %v1708_v36 = vsel %vm1291_vm1, %v1698_v39, 0 }
 0x47b   : > { %v2757_v63 = vpop.eup %2756 }
 0x47c   : > { %v2759_v40 = vpop.eup %2758  ;;  %v1501_v47 = vmul.f32 %v2757_v63, %v2745_v3 }
 0x47d   : > { %v1621_v6 = vpop.permute.xlu1 %1620  ;;  %v2761_v43 = vpop.eup %2760  ;;  %v1498_v26 = vmul.f32 %v2759_v40, %v3510_v12 }
 0x47e   : > { %2558 = vmatmul.mubr.msk.bf16.vlgmr.msra.gmra.mxu0 %vm1291_vm1, %v1621_v6  ;;  %v1500_v20 = vmul.f32 %v2761_v43, %v3505_v45 }
 0x47f   : > { %v2763_v46 = vpop.eup %2762 }
 0x480   : > { %v1499_v19 = vmul.f32 %v2763_v46, %v2747_v61  ;;  %v1505_v49 = vpack.c.bf16 %v1501_v47, %v1500_v20 }
 0x481   : > { %v1694_v9 = vpop.permute.xlu1 %1693 }
 0x482   : > { %v1504_v48 = vpack.c.bf16 %v1499_v19, %v1498_v26 }
 0x484   : > { %2549 = vmatprep.mubr.msk.bf16.mxu1 %vm523_vm0, %v1504_v48 }
 0x485   : > { %2550 = vmatmul.mubr.msk.bf16.vlgmr.msra.gmra.mxu1 %vm523_vm0, %v1505_v49 }
 0x486   : > { %2562 = vmatpush3.bf16.xpose.msra.mxu1 %v1711_v42  ;;  %2565 = vmatprep.mubr.msk.bf16.mxu1 %vm1291_vm1, %v1692_v50 }
 0x487   : > { %2600 = vmatprep.subr.msk.bf16.mxu1 %vm1291_vm1, %v1698_v39 }
 0x48e   : > { %2564 = vmatpush3.bf16.xpose.msra.mxu1 %v1708_v36 }
 0x495   : > { %2566 = vmatmul.mubr.msk.bf16.vlgmr.msra.gmra.mxu1 %vm1291_vm1, %v1694_v9 }
 0x50c   : > { %v3554_v13 = vpop.f32.mrf.mxu1 }
 0x50e   : > { %v3556_v51 = vpop.f32.mrf.mxu1 }
 0x510   : > { %v3558_v56 = vpop.f32.mrf.mxu1 }
 0x512   : > { %v3561_v12 = vpop.f32.mrf.mxu1 }
 0x53e   : > { %v2559_v28 = vpop.f32.mrf.mxu0 }
 0x53f   : > { %v1768_v59 = vsel %vm523_vm0, %v2559_v28, -inf }
 0x540   : > { %v1674_v32 = vpop.f32.mrf.mxu0 }
 0x541   : > { %v1762_v45 = vsel %vm523_vm0, %v1674_v32, -inf }
 0x542   : > { %1763 = vmax.xlane.f32.xlu0 %v1762_v45  ;;  %v2560_v11 = vpop.f32.mrf.mxu0 }
 0x543   : > { %v1771_v55 = vsel %vm523_vm0, %v2560_v11, -inf }
 0x544   : > { %v1677_v29 = vpop.f32.mrf.mxu0 }
 0x545   : > { %v1765_v15 = vsel %vm523_vm0, %v1677_v29, -inf  ;;  %v3565_v57 = vpop.f32.mrf.mxu1 }
 0x546   : > { %1769 = vmax.xlane.f32.xlu0 %v1768_v59  ;;  %1766 = vmax.xlane.f32.xlu1 %v1765_v15 }
 0x547   : > { %v3568_v2 = vpop.f32.mrf.mxu1 }
 0x549   : > { %v3570_v22 = vpop.f32.mrf.mxu1 }
 0x54a   : > { %1772 = vmax.xlane.f32.xlu0 %v1771_v55 }
 0x54b   : > { %v3572_v52 = vpop.f32.mrf.mxu1 }
 0x555   : > { %v2567_v3 = vpop.f32.mrf.mxu1 }
 0x556   : > { %v1780_v23 = vsel %vm523_vm0, %v2567_v3, -inf }
 0x557   : > { %v1747_v30 = vpop.f32.mrf.mxu1 }
 0x558   : > { %v1774_v61 = vsel %vm523_vm0, %v1747_v30, -inf }
 0x559   : > { %1775 = vmax.xlane.f32.xlu0 %v1774_v61  ;;  %v2568_v33 = vpop.f32.mrf.mxu1 }
 0x55a   : > { %v1783_v31 = vsel %vm523_vm0, %v2568_v33, -inf }
 0x55b   : > { %v1750_v37 = vpop.f32.mrf.mxu1 }
 0x55c   : > { %v1777_v27 = vsel %vm523_vm0, %v1750_v37, -inf }
 0x55d   : > { %1781 = vmax.xlane.f32.xlu0 %v1780_v23  ;;  %1778 = vmax.xlane.f32.xlu1 %v1777_v27 }
 0x561   : > { %1784 = vmax.xlane.f32.xlu1 %v1783_v31 }
 0x5cb   : > { %v1764_v17 = vpop.xlane.xlu0 %1763 }
 0x5cc   : > { %v1786_v1 = vsub.f32 %v1674_v32, %v1764_v17 }
 0x5ce   : > { %v1794_v5 = vmul.f32 1.442695, %v1786_v1 }
 0x5cf   : > { %v1767_v44 = vpop.xlane.xlu1 %1766  ;;  %v1770_v10 = vpop.xlane.xlu0 %1769 }
 0x5d0   : > { %2764 = vpow2.f32 %v1794_v5  ;;  %v1787_v4 = vsub.f32 %v1677_v29, %v1767_v44  ;;  %v1788_v18 = vsub.f32 %v2559_v28, %v1770_v10 }
 0x5d2   : > { %v1796_v54 = vmul.f32 1.442695, %v1787_v4  ;;  %v1798_v53 = vmul.f32 1.442695, %v1788_v18 }
 0x5d3   : > { %v1773_v14 = vpop.xlane.xlu0 %1772 }
 0x5d4   : > { %2766 = vpow2.f32 %v1796_v54  ;;  %v1789_v16 = vsub.f32 %v2560_v11, %v1773_v14 }
 0x5d5   : > { %2768 = vpow2.f32 %v1798_v53 }
 0x5d6   : > { %v1800_v62 = vmul.f32 1.442695, %v1789_v16 }
 0x5d8   : > { %2770 = vpow2.f32 %v1800_v62 }
 0x5dd   : > { %v2765_v24 = vpop.eup %2764 }
 0x5de   : > { %v1810_v25 = vsel %vm523_vm0, %v2765_v24, 0.0 }
 0x5df   : > { %1811 = vadd.xlane.f32.xlu0 %v1810_v25 }
 0x5e1   : > { %v2767_v0 = vpop.eup %2766 }
 0x5e2   : > { %v3579_v8 = vpop.eup %2768  ;;  %v1776_v34 = vpop.xlane.xlu0 %1775  ;;  %v1813_v35 = vsel %vm523_vm0, %v2767_v0, 0.0 }
 0x5e3   : > { %1814 = vadd.xlane.f32.xlu1 %v1813_v35  ;;  %v1816_v38 = vsel %vm523_vm0, %v3579_v8, 0.0  ;;  %v1790_v39 = vsub.f32 %v1747_v30, %v1776_v34 }
 0x5e4   : > { %1817 = vadd.xlane.f32.xlu0 %v1816_v38 }
 0x5e5   : > { %v2771_v21 = vpop.eup %2770  ;;  %v1802_v46 = vmul.f32 1.442695, %v1790_v39  ;;  %v2682_v39 = vld [vmem:[%s3726_s8 + $0x8] sm:$0xff]  }
 0x5e6   : > { %v1782_v63 = vpop.xlane.xlu0 %1781  ;;  %v1819_v40 = vsel %vm523_vm0, %v2771_v21, 0.0  ;;  %v1779_v20 = vpop.xlane.xlu1 %1778 }
 0x5e7   : > { %v1792_v6 = vsub.f32 %v2567_v3, %v1782_v63  ;;  %1820 = vadd.xlane.f32.xlu1 %v1819_v40  ;;  %v1791_v50 = vsub.f32 %v1750_v37, %v1779_v20  ;;  %v2683_v40 = vld [vmem:[%s3726_s8] sm:$0xff]  }
 0x5e9   : > { %v1806_v43 = vmul.f32 1.442695, %v1792_v6  ;;  %v1804_v36 = vmul.f32 1.442695, %v1791_v50 }
 0x5ea   : > { %v1785_v49 = vpop.xlane.xlu1 %1784 }
 0x5eb   : > { %2772 = vpow2.f32 %v1806_v43  ;;  %v1793_v42 = vsub.f32 %v2568_v33, %v1785_v49 }
 0x5ec   : > { %2774 = vpow2.f32 %v1802_v46 }
 0x5f8   : > { %1921 = vrot.lane.b32.xlu1 %v3486_v41, %s2890_s23  ;;  %v3587_v47 = vpop.eup %2772  ;;  %v1808_v41 = vmul.f32 1.442695, %v1793_v42 }
 0x5f9   : > { %v1828_v26 = vsel %vm523_vm0, %v3587_v47, 0.0  ;;  %v3591_v19 = vpop.eup %2774 }
 0x5fa   : > { %1829 = vadd.xlane.f32.xlu0 %v1828_v26  ;;  %v1822_v48 = vsel %vm523_vm0, %v3591_v19, 0.0  ;;  %2776 = vpow2.f32 %v1808_v41 }
 0x5fb   : > { %2778 = vpow2.f32 %v1804_v36 }
 0x5fc   : > { %1856 = vrot.lane.b32.xlu1 %v3480_v58, %s2890_s23 }
 0x5fe   : > { %1823 = vadd.xlane.f32.xlu0 %v1822_v48 }
 0x607   : > { %v2777_v9 = vpop.eup %2776 }
 0x608   : > { %v1831_v28 = vsel %vm523_vm0, %v2777_v9, 0.0  ;;  %v2779_v32 = vpop.eup %2778 }
 0x609   : > { %v1825_v58 = vsel %vm523_vm0, %v2779_v32, 0.0 }
 0x614   : > { %1858 = vrot.lane.b32.xlu0 %v3478_v7, %s2890_s23 }
 0x620   : > { %1832 = vadd.xlane.f32.xlu1 %v1831_v28 }
 0x624   : > { %1826 = vadd.xlane.f32.xlu1 %v1825_v58 }
 0x635   : > { %1919 = vrot.lane.b32.xlu1 %v3488_v60, %s2890_s23  ;;  %s501_s23 = sadd.s32 %s2304_s29, %s499_s28  ;;  %s2371_s28 = sshll.u32 %s2137_s16, 7 }
 0x636   : > { %s3659_s17 = scalar_lea.hbm %s3728_s10, %s2371_s28  ;;  %s2892_s29 = smov [#allocation2]  }
 0x668   : > { %v1812_v45 = vpop.xlane.xlu0 %1811 }
 0x669   : > { %2780 = vrcp.f32 %v1812_v45 }
 0x66c   : > { %v1815_v11 = vpop.xlane.xlu1 %1814 }
 0x66d   : > { %2782 = vrcp.f32 %v1815_v11  ;;  %v1818_v61 = vpop.xlane.xlu0 %1817 }
 0x670   : > { %v1821_v29 = vpop.xlane.xlu1 %1820 }
 0x671   : > { %2784 = vrcp.f32 %v1821_v29 }
 0x672   : > { %2786 = vrcp.f32 %v1818_v61 }
 0x674   : > { %v1922_v59 = vpop.permute.xlu1 %1921 }
 0x675   : > { %2577 = vmatprep.subr.bf16.mxu1 %v1922_v59 }
 0x676   : > { %2578 = vmatpush3.bf16.msra.mxu1 %v1922_v59  ;;  %v2781_v7 = vpop.eup %2780 }
 0x677   : > { %v1842_v55 = vmul.f32 %v2781_v7, %v2765_v24 }
 0x678   : > { %v1857_v31 = vpop.permute.xlu1 %1856 }
 0x67a   : > { %v2783_v15 = vpop.eup %2782 }
 0x67b   : > { %v1843_v3 = vmul.f32 %v2783_v15, %v2767_v0 }
 0x67d   : > { %v1850_v30 = vpack.c.bf16 %v1843_v3, %v1842_v55 }
 0x67e   : > { %v2785_v37 = vpop.eup %2784 }
 0x67f   : > { %2573 = vmatprep.mubr.msk.bf16.mxu0 %vm523_vm0, %v1850_v30  ;;  %v2787_v27 = vpop.eup %2786  ;;  %v1845_v17 = vmul.f32 %v2785_v37, %v2771_v21 }
 0x680   : > { %v1844_v1 = vmul.f32 %v2787_v27, %v3579_v8 }
 0x682   : > { %v1851_v5 = vpack.c.bf16 %v1845_v17, %v1844_v1 }
 0x683   : > { %v1830_v33 = vpop.xlane.xlu0 %1829 }
 0x687   : > { %v1824_v60 = vpop.xlane.xlu0 %1823 }
 0x68b   : > { %v1859_v23 = vpop.permute.xlu0 %1858 }
 0x68c   : > { %2569 = vmatprep.subr.bf16.mxu0 %v1859_v23 }
 0x68d   : > { %2570 = vmatpush3.bf16.msra.mxu0 %v1859_v23 }
 0x68e   : > { %2571 = vmatprep.subr.bf16.mxu0 %v1857_v31 }
 0x691   : > { %2572 = vmatpush3.bf16.msra.mxu0 %v1857_v31 }
 0x692   : > { %2585 = vmatprep.subr.bf16.mxu0 %v2682_v39 }
 0x694   : > { %2574 = vmatmul.mubr.msk.bf16.vlgmr.msra.gmra.mxu0 %vm523_vm0, %v1851_v5 }
 0x695   : > { %2586 = vmatpush3.bf16.msra.mxu0 %v2682_v39 }
 0x696   : > { %2587 = vmatprep.subr.bf16.mxu0 %v2683_v40 }
 0x699   : > { %2588 = vmatpush3.bf16.msra.mxu0 %v2683_v40 }
 0x6a9   : > { %v1833_v44 = vpop.xlane.xlu1 %1832 }
 0x6aa   : > { %2788 = vrcp.f32 %v1833_v44 }
 0x6ab   : > { %2790 = vrcp.f32 %v1824_v60 }
 0x6ac   : > { %2792 = vrcp.f32 %v1830_v33 }
 0x6ad   : > { %v1827_v10 = vpop.xlane.xlu1 %1826 }
 0x6ae   : > { %2794 = vrcp.f32 %v1827_v10 }
 0x6b1   : > { %v1920_v4 = vpop.permute.xlu1 %1919 }
 0x6b2   : > { %2579 = vmatprep.subr.bf16.mxu1 %v1920_v4 }
 0x6b3   : > { %2580 = vmatpush3.bf16.msra.mxu1 %v1920_v4 }
 0x6b7   : > { %v2789_v18 = vpop.eup %2788 }
 0x6b8   : > { %v2791_v54 = vpop.eup %2790  ;;  %v1849_v16 = vmul.f32 %v2789_v18, %v2777_v9 }
 0x6b9   : > { %v2793_v53 = vpop.eup %2792  ;;  %v1846_v62 = vmul.f32 %v2791_v54, %v3591_v19 }
 0x6ba   : > { %v1848_v25 = vmul.f32 %v2793_v53, %v3587_v47 }
 0x6bb   : > { %v2795_v14 = vpop.eup %2794 }
 0x6bc   : > { %v1847_v24 = vmul.f32 %v2795_v14, %v2779_v32  ;;  %v1853_v8 = vpack.c.bf16 %v1849_v16, %v1848_v25 }
 0x6be   : > { %v1852_v0 = vpack.c.bf16 %v1847_v24, %v1846_v62 }
 0x6c0   : > { %2581 = vmatprep.mubr.msk.bf16.mxu1 %vm523_vm0, %v1852_v0 }
 0x6c1   : > { %2582 = vmatmul.mubr.msk.bf16.vlgmr.msra.gmra.mxu1 %vm523_vm0, %v1853_v8 }
 0x754   : > { %v2575_v34 = vpop.f32.mrf.mxu0 }
 0x756   : > { %v1902_v35 = vpop.f32.mrf.mxu0 }
 0x757   : > { %1988 = vrot.lane.b32.xlu0 %v1902_v35, %s2891_s24 }
 0x758   : > { %v2576_v38 = vpop.f32.mrf.mxu0 }
 0x75a   : > { %v1905_v21 = vpop.f32.mrf.mxu0 }
 0x75b   : > { %1992 = vrot.lane.b32.xlu0 %v2575_v34, %s2891_s24  ;;  %1990 = vrot.lane.b32.xlu1 %v1905_v21, %s2891_s24 }
 0x75f   : > { %1994 = vrot.lane.b32.xlu1 %v2576_v38, %s2891_s24 }
 0x781   : > { %v2583_v63 = vpop.f32.mrf.mxu1 }
 0x783   : > { %v1965_v6 = vpop.f32.mrf.mxu1 }
 0x784   : > { %1996 = vrot.lane.b32.xlu0 %v1965_v6, %s2891_s24 }
 0x785   : > { %v2584_v43 = vpop.f32.mrf.mxu1 }
 0x787   : > { %v1968_v46 = vpop.f32.mrf.mxu1 }
 0x788   : > { %2000 = vrot.lane.b32.xlu0 %v2583_v63, %s2891_s24  ;;  %1998 = vrot.lane.b32.xlu1 %v1968_v46, %s2891_s24 }
 0x78c   : > { %2002 = vrot.lane.b32.xlu1 %v2584_v43, %s2891_s24  ;;  %s2305_s24 = sshll.u32 %s501_s23, 3  ;;  %s2800_s23 = sshll.u32 %s2892_s29, 4  ;;  %s2801_s23 = int_to_ptr.vmem [resolvable:$false] %s2800_s23 }
 0x78d   : > { %s503_s25 = scalar_lea.vmem %s3721_s3, %s2305_s24  ;;  %s2802_s24 = scalar_lea.vmem %s2801_s23, 1024 }
 0x78e   : > { %v2114_v33 = vld [vmem:[%s503_s25 + $0x10] sm:$0xff]  ;;  %v2112_v23 = vld [vmem:[%s503_s25] sm:$0xff]  ;;  %v2115_v1 = vld [vmem:[%s503_s25 + $0x18] sm:$0xff]  ;;  %p2803_p5 = scmp.lt.s32.totalorder %s3661_s0, %s2801_s23  ;;  %p2804_p6 = scmp.lt.s32.totalorder %s2802_s24, %s2796_s19 }
 0x78f   : > { %v2113_v4 = vld [vmem:[%s503_s25 + $0x8] sm:$0xff] }
 0x790   : > { %p2805_p7 = por %p2804_p6, %p2803_p5 }
 0x792   : > { %p2806_p9 = pnand %p2805_p7, %p2799_p4 }
 0x7c9   : > { %v1989_v47 = vpop.permute.xlu0 %1988 }
 0x7ca   : > { %v2012_v48 = vsel %vm1291_vm1, %v3556_v51, %v1989_v47 }
 0x7cb   : > { %v2020_v36 = vsel %vm523_vm0, %v2012_v48, 0.0 }
 0x7cd   : > { %v1993_v26 = vpop.permute.xlu0 %1992  ;;  %v1991_v19 = vpop.permute.xlu1 %1990 }
 0x7ce   : > { %v2014_v20 = vsel %vm1291_vm1, %v3554_v13, %v1993_v26  ;;  %v2013_v49 = vsel %vm1291_vm1, %v3561_v12, %v1991_v19 }
 0x7cf   : > { %v2021_v42 = vsel %vm523_vm0, %v2014_v20, 0.0  ;;  %v2023_v9 = vsel %vm523_vm0, %v2013_v49, 0.0 }
 0x7d0   : > { %v2022_v32 = vadd.f32 %v2021_v42, %v2020_v36 }
 0x7d1   : > { %v1995_v50 = vpop.permute.xlu1 %1994 }
 0x7d2   : > { %v2015_v41 = vsel %vm1291_vm1, %v3558_v56, %v1995_v50 }
 0x7d3   : > { %v2024_v28 = vsel %vm523_vm0, %v2015_v41, 0.0 }
 0x7d4   : > { %v2025_v13 = vadd.f32 %v2024_v28, %v2023_v9 }
 0x7d6   : > { %v2032_v58 = vpack.c.bf16 %v2025_v13, %v2022_v32 }
 0x7d8   : > { %2589 = vmatprep.mubr.msk.bf16.mxu0 %vm523_vm0, %v2032_v58 }
 0x7f6   : > { %v1997_v51 = vpop.permute.xlu0 %1996 }
 0x7f7   : > { %v2016_v56 = vsel %vm1291_vm1, %v3568_v2, %v1997_v51 }
 0x7f8   : > { %v2026_v55 = vsel %vm523_vm0, %v2016_v56, 0.0 }
 0x7fa   : > { %v2001_v12 = vpop.permute.xlu0 %2000  ;;  %v1999_v45 = vpop.permute.xlu1 %1998 }
 0x7fb   : > { %v2018_v11 = vsel %vm1291_vm1, %v3565_v57, %v2001_v12  ;;  %v2017_v29 = vsel %vm1291_vm1, %v3572_v52, %v1999_v45 }
 0x7fc   : > { %v2027_v59 = vsel %vm523_vm0, %v2018_v11, 0.0  ;;  %v2029_v3 = vsel %vm523_vm0, %v2017_v29, 0.0 }
 0x7fd   : > { %v2028_v30 = vadd.f32 %v2027_v59, %v2026_v55 }
 0x7fe   : > { %v2003_v7 = vpop.permute.xlu1 %2002 }
 0x7ff   : > { %v2019_v15 = vsel %vm1291_vm1, %v3570_v22, %v2003_v7  ;;  %v2363_v22 = vld [vmem:[%s3727_s9] ss:$0 sm:$0xff] }
 0x800   : > { %v2030_v57 = vsel %vm523_vm0, %v2019_v15, 0.0 }
 0x801   : > { %v2031_v2 = vadd.f32 %v2030_v57, %v2029_v3 }
 0x803   : > { %v2033_v61 = vpack.c.bf16 %v2031_v2, %v2028_v30 }
 0x805   : > { %2590 = vmatmul.mubr.msk.bf16.vlgmr.msra.gmra.mxu0 %vm523_vm0, %v2033_v61 }
 0x8c5   : > { %v2591_v52 = vpop.f32.mrf.mxu0 }
 0x8c6   : > { %v2106_v60 = vadd.f32 %v2591_v52, %v2363_v22 }
 0x8c7   : > { %v2097_v37 = vpop.f32.mrf.mxu0 }
 0x8c8   : > { %v2118_v27 = vadd.f32 %v2114_v33, %v2106_v60  ;;  %v2098_v31 = vadd.f32 %v2363_v22, %v2097_v37 }
 0x8c9   : > { %v2592_v17 = vpop.f32.mrf.mxu0 }
 0x8ca   : > { %2122 = vst.msk [vmem:[%s461_s21 + $0x10] sm:$0xff] %vm523_vm0, %v2118_v27  ;;  %v2116_v5 = vadd.f32 %v2112_v23, %v2098_v31  ;;  %v2109_v44 = vadd.f32 %v2592_v17, %v2363_v22 }
 0x8cb   : > { %v2100_v10 = vpop.f32.mrf.mxu0 }
 0x8cc   : > { %2120 = vst.msk [vmem:[%s461_s21] sm:$0xff] %vm523_vm0, %v2116_v5  ;;  %v2119_v18 = vadd.f32 %v2115_v1, %v2109_v44  ;;  %v2101_v54 = vadd.f32 %v2363_v22, %v2100_v10 }
 0x8ce   : > { %2123 = vst.msk [vmem:[%s461_s21 + $0x18] sm:$0xff] %vm523_vm0, %v2119_v18  ;;  %v2117_v53 = vadd.f32 %v2113_v4, %v2101_v54 }
 0x8d0   : > { %2121 = vst.msk [vmem:[%s461_s21 + $0x8] sm:$0xff] %vm523_vm0, %v2117_v53 }
 0x8d1   : > { %2809 = shalt.err (!%p2806_p9)
}
 0x8d2   : > { %s2810_s30 = scalar_lea.hbm %s3659_s17, 512  ;;  %s2814_s25 = scalar_lea.hbm %s3728_s10, 2048 }
 0x8d3   : > { %p2811_p10 = scmp.ne.s32.totalorder %s3659_s17, %s2810_s30  ;;  %p2815_p13 = scmp.lt.s32.totalorder %s3659_s17, %s3728_s10 }
 0x8d4   : > { %p2816_p0 = scmp.lt.s32.totalorder %s2814_s25, %s2810_s30 }
 0x8d5   : > { %p2812_p11 = pnand %p2811_p10, %p3001_p3 }
 0x8d6   : > { %p2817_p1 = por %p2816_p0, %p2815_p13 }
 0x8d7   : > { %p2813_p12 = pneg %p2812_p11 }
 0x8d9   : > { %p2818_p2 = pnand %p2817_p1, %p2813_p12 }
 0x8db   : > { %2821 = shalt.err (!%p2818_p2)
}
 0x8dc   : > { %s2893_s28 = smov 128   ;;  %s2894_s1 = smov 8  }
 0x8dd   : > { %2601 = dma.vmem_to_hbm [thread:$0]  (%p3001_p3), %s3661_s0, 512, %s3659_s17, %s3667_s2, %s2893_s28, %s2893_s28, %s2894_s1  }
 0x8de PF: > { %p2607_p4 = scmp.ge.s32.totalorder %s2888_s20, 2  ;;  %s2155_s4 = sand.u32 1, %s2860_s13  }
 0x8df   : > { %s2156_s19 = scalar_lea.sflag [#allocation3], %s2155_s4 }
 0x8e0   : > { %p2604_p5 = pnand %p2607_p4, %p3010_p8 }
 0x8e2   : > { %p2605_p6 = pneg %p2604_p5 }
 0x8e4   : > { %2855 = dma.done.wait (%p2605_p6), %s2156_s19, 512  }
 0x8e5   : > { %2857 = vsyncadd (%p2605_p6), %s2156_s19, 4294966784  ;;  %s23_s20 = sadd.s32 1, %s2888_s20   ;;  %s3745_s17 = sld [smem:[#allocation5_spill]] }
 0x8e6   : > { %p20_p7 = scmp.ge.s32.totalorder %s23_s20, 6   ;;  %s3746_s26 = sld [smem:[#allocation6_spill]] }
 0x8e7   : > { %s3747_s19 = sld [smem:[#allocation7_spill]]  ;;  %s3748_s13 = smov %s2864_s14 }
 0x8e8   : > { %s3749_s14 = smov %s2868_s15  ;;  %s3750_s15 = smov %s3019_s11 }
 0x8e9   : > { %s3751_s16 = smov %s2880_s18  ;;  %22 = sbr.rel (!%p20_p7) target bundleno = 10 (0xa), region = 112 }
 0x8ec   : > { %s3752_s18 = smov %s3746_s26 }
 0x8ee   :  { %2161 = vsyncpa [#allocation3], 1 }
 0x8ef   :  { %2163 = vsyncpa [#allocation3 + $0x1], 1 }

</bundles_post_ra>
